<compile_context>
chip_gen: v7x
topology: tpu7x:2x2x1
jax: 0.10.0
libtpu: 0.0.40
codegen_flags: <defaults>
</compile_context>

<pallas_src>
import functools

import jax
import jax.numpy as jnp
from jax import lax
from jax.experimental import pallas as pl
from jax.experimental.pallas import tpu as pltpu

IN_DIM = 768    # BERT hidden size (CLS embedding width)
OUT_DIM = 256   # projection output width
EPS = 1e-12     # matches torch.nn.functional.normalize default eps
MAX_TILE = 512  # row-tile cap for both kernels

# TODO(synk): BERT encoder + tokenizer (string inputs, pretrained HF weights)
# are external to the kernel; Dropout(0.1) is identity at inference.


def _round_up(n: int, m: int) -> int:
    return ((n + m - 1) // m) * m


def _pad_rows_to(x, n_pad: int):
    n = x.shape[0]
    if n == n_pad:
        return x
    return jnp.pad(x, ((0, n_pad - n), (0, 0)))


# --------------------------------------------------------------------------
# Kernel 1: projection + bias + L2 normalize (the "encode" epilogue of BERT).
# --------------------------------------------------------------------------
def _encode_kernel(x_ref, w_ref, b_ref, out_ref):
    """x_ref: [TM, 768] bf16, w_ref: [768, 256] bf16, b_ref: [1, 256] f32,
    out_ref: [TM, 256] bf16 (L2-normalized projection)."""
    # MXU matmul with f32 accumulation; bias add stays in f32.
    proj = jnp.dot(x_ref[...], w_ref[...], preferred_element_type=jnp.float32)
    proj = proj + b_ref[...]          # [1,256] broadcast, hoisted (no inner loop)
    # torch F.normalize semantics: x / max(||x||, eps) == x * rsqrt(max(||x||^2, eps^2))
    sq = jnp.sum(proj * proj, axis=-1, keepdims=True)   # XLU reduce
    inv = lax.rsqrt(jnp.maximum(sq, EPS * EPS))          # EUP rsqrt, no serial sqrt+div
    out_ref[...] = (proj * inv).astype(out_ref.dtype)


def _encode(x, w, b, row_tile: int):
    """Row-tiled pallas_call of _encode_kernel over x: [N_pad, 768]."""
    n = x.shape[0]
    assert n % row_tile == 0
    itemsize = x.dtype.itemsize
    cost = pl.CostEstimate(
        flops=2 * n * IN_DIM * OUT_DIM,
        transcendentals=n,  # one rsqrt per row
        bytes_accessed=(n * IN_DIM * itemsize            # x
                        + IN_DIM * OUT_DIM * itemsize    # W (resident, fetched once)
                        + OUT_DIM * 4                    # bias
                        + n * OUT_DIM * itemsize),       # normalized output
    )
    return pl.pallas_call(
        _encode_kernel,
        out_shape=jax.ShapeDtypeStruct((n, OUT_DIM), x.dtype),
        grid_spec=pltpu.PrefetchScalarGridSpec(
            num_scalar_prefetch=0,
            grid=(n // row_tile,),
            in_specs=[
                pl.BlockSpec((row_tile, IN_DIM), lambda i: (i, 0)),
                pl.BlockSpec((IN_DIM, OUT_DIM), lambda i: (0, 0)),  # W stays resident
                pl.BlockSpec((1, OUT_DIM), lambda i: (0, 0)),       # bias stays resident
            ],
            out_specs=pl.BlockSpec((row_tile, OUT_DIM), lambda i: (i, 0)),
        ),
        compiler_params=pltpu.CompilerParams(dimension_semantics=("parallel",)),
        cost_estimate=cost,
    )(x, w, b)


# --------------------------------------------------------------------------
# Kernel 2: cosine-similarity matrix  Q_norm @ P_norm^T  (tiled).
# --------------------------------------------------------------------------
def _similarity_kernel(q_ref, p_ref, out_ref):
    """q_ref: [TM, 256], p_ref: [TN, 256], out_ref: [TM, TN] f32.
    Contract the feature dim of both operands directly (no .T / XLU transpose)."""
    out_ref[...] = lax.dot_general(
        q_ref[...], p_ref[...],
        dimension_numbers=(((1,), (1,)), ((), ())),
        preferred_element_type=jnp.float32,
    )


def _similarity(q_norm, p_norm, tm: int, tn: int):
    nq_pad, np_pad = q_norm.shape[0], p_norm.shape[0]
    assert nq_pad % tm == 0 and np_pad % tn == 0
    cost = pl.CostEstimate(
        flops=2 * nq_pad * np_pad * OUT_DIM,
        transcendentals=0,
        bytes_accessed=(nq_pad * OUT_DIM * q_norm.dtype.itemsize
                        + np_pad * OUT_DIM * p_norm.dtype.itemsize
                        + nq_pad * np_pad * 4),
    )
    return pl.pallas_call(
        _similarity_kernel,
        out_shape=jax.ShapeDtypeStruct((nq_pad, np_pad), jnp.float32),
        grid_spec=pltpu.PrefetchScalarGridSpec(
            num_scalar_prefetch=0,
            grid=(nq_pad // tm, np_pad // tn),
            in_specs=[
                pl.BlockSpec((tm, OUT_DIM), lambda i, j: (i, 0)),
                pl.BlockSpec((tn, OUT_DIM), lambda i, j: (j, 0)),
            ],
            out_specs=pl.BlockSpec((tm, tn), lambda i, j: (i, j)),
        ),
        compiler_params=pltpu.CompilerParams(
            dimension_semantics=("parallel", "parallel")),
        cost_estimate=cost,
    )(q_norm, p_norm)


# --------------------------------------------------------------------------
# Wrapper: pad to lane/sublane-dense tiles, cast MXU operands to bf16,
# run encode for Q and P once each, then the tiled similarity matmul.
# --------------------------------------------------------------------------
@functools.partial(jax.jit, static_argnames=("compute_dtype",))
def semantic_search_forward(query_emb, product_emb, w_t, b,
                            compute_dtype=jnp.bfloat16):
    """query_emb: [Nq, 768], product_emb: [Np, 768] (CLS embeddings, f32),
    w_t: [768, 256] (PyTorch Linear weight, pre-transposed), b: [1, 256].
    Returns the [Nq, Np] cosine-similarity matrix in f32."""
    nq, np_ = query_emb.shape[0], product_emb.shape[0]

    # Query rows: sublane-dense (multiple of 8), capped so the per-step VMEM
    # footprint stays small even on v7x's 64 MiB VMEM.
    tm = min(MAX_TILE, _round_up(max(nq, 1), 8))
    nq_pad = _round_up(nq, tm)
    # Product rows: lane-dense output (multiple of 128) -> unmasked vst stores.
    tn = min(MAX_TILE, _round_up(max(np_, 1), 128))
    np_pad = _round_up(np_, tn)

    # bf16 operands for the MXU / halved HBM traffic; f32 accumulation and a
    # pure-f32 normalize epilogue inside the kernel (v5e-friendly: no bf16 VPU).
    q = _pad_rows_to(query_emb, nq_pad).astype(compute_dtype)
    p = _pad_rows_to(product_emb, np_pad).astype(compute_dtype)
    w = w_t.astype(compute_dtype)
    bias = b.reshape(1, OUT_DIM).astype(jnp.float32)

    q_norm = _encode(q, w, bias, tm)   # [nq_pad, 256] bf16, L2-normalized
    p_norm = _encode(p, w, bias, tn)   # [np_pad, 256] bf16, L2-normalized
    sim = _similarity(q_norm, p_norm, tm, tn)
    # Padded rows/columns are garbage-by-construction; slice them away.
    return sim[:nq, :np_]


# --------------------------------------------------------------------------
# Pure-JAX references (for correctness checks).
# --------------------------------------------------------------------------
def reference_forward(query_emb, product_emb, w_t, b, compute_dtype=jnp.float32):
    """Same math as the kernels, with matmul operands cast to compute_dtype."""
    bias = b.reshape(1, OUT_DIM).astype(jnp.float32)

    def encode(x):
        proj = jnp.dot(x.astype(compute_dtype), w_t.astype(compute_dtype),
                       preferred_element_type=jnp.float32) + bias
        norm = jnp.maximum(jnp.linalg.norm(proj, axis=-1, keepdims=True), EPS)
        return (proj / norm).astype(compute_dtype)

    qn, pn = encode(query_emb), encode(product_emb)
    return jnp.dot(qn, pn.T, preferred_element_type=jnp.float32)


if __name__ == "__main__":
    key = jax.random.PRNGKey(0)
    k_q, k_p, k_w, k_b = jax.random.split(key, 4)

    # Small deterministic example: 4 queries, 8 products, BERT CLS dim 768.
    num_queries, num_products = 4, 8
    query_cls = jax.random.normal(k_q, (num_queries, IN_DIM), dtype=jnp.float32)
    product_cls = jax.random.normal(k_p, (num_products, IN_DIM), dtype=jnp.float32)

    # Deterministic init for nn.Linear(768, 256), stored pre-transposed.
    bound = 1.0 / jnp.sqrt(jnp.float32(IN_DIM))
    w_t = jax.random.uniform(k_w, (IN_DIM, OUT_DIM), jnp.float32, -bound, bound)
    b = jax.random.uniform(k_b, (1, OUT_DIM), jnp.float32, -bound, bound)

    sim = semantic_search_forward(query_cls, product_cls, w_t, b)
    sim = jax.block_until_ready(sim)
    assert sim.shape == (num_queries, num_products)

    # Check against a matching-precision (bf16-operand) reference ...
    ref_bf16 = reference_forward(query_cls, product_cls, w_t, b,
                                 compute_dtype=jnp.bfloat16)
    assert jnp.allclose(sim, ref_bf16, atol=5e-3, rtol=5e-3), \
        "mismatch vs bf16 reference"
    # ... and loosely against the full-f32 reference (bf16 quantization error).
    ref_f32 = reference_forward(query_cls, product_cls, w_t, b,
                                compute_dtype=jnp.float32)
    assert jnp.allclose(sim, ref_f32, atol=5e-2, rtol=5e-2), \
        "mismatch vs f32 reference"

    print("KERNEL_OK")
</pallas_src>

<mosaic_0001>
module attributes {stable_mosaic.version = 11 : i64} {
  func.func @_encode_kernel(%arg0: i32, %arg1: memref<128x768xbf16, #tpu.memory_space<vmem>>, %arg2: memref<768x256xbf16, #tpu.memory_space<vmem>>, %arg3: memref<1x256xf32, #tpu.memory_space<vmem>>, %arg4: memref<128x256xbf16, #tpu.memory_space<vmem>>) attributes {dimension_semantics = [#tpu.dimension_semantics<parallel>], iteration_bounds = array<i64: 1>, scalar_prefetch = 0 : i64, scratch_operands = 0 : i64, tpu.core_type = #tpu.core_type<tc>, window_params = [{transform_indices = @transform_0, window_bounds = array<i64: 128, 768>}, {pipeline_mode = #tpu.pipeline_mode<synchronous>, transform_indices = @transform_1, window_bounds = array<i64: 768, 256>}, {pipeline_mode = #tpu.pipeline_mode<synchronous>, transform_indices = @transform_2, window_bounds = array<i64: 1, 256>}, {transform_indices = @transform_3, window_bounds = array<i64: 128, 256>}]} {
    %c0 = arith.constant 0 : index
    %c0_0 = arith.constant 0 : index
    %0 = vector.load %arg1[%c0, %c0_0] : memref<128x768xbf16, #tpu.memory_space<vmem>>, vector<128x768xbf16>
    %c0_1 = arith.constant 0 : index
    %c0_2 = arith.constant 0 : index
    %1 = vector.load %arg2[%c0_1, %c0_2] : memref<768x256xbf16, #tpu.memory_space<vmem>>, vector<768x256xbf16>
    %cst = arith.constant dense<0.000000e+00> : vector<128x256xf32>
    %2 = tpu.matmul %0, %1, %cst {dimension_numbers = #tpu.dot_dimension_numbers<[1], [0], [0], [1], [0, 0, 1, 1], [], []>} : vector<128x768xbf16>, vector<768x256xbf16>, vector<128x256xf32> -> vector<128x256xf32>
    %c0_3 = arith.constant 0 : index
    %c0_4 = arith.constant 0 : index
    %3 = vector.load %arg3[%c0_3, %c0_4] : memref<1x256xf32, #tpu.memory_space<vmem>>, vector<1x256xf32>
    %4 = vector.broadcast %3 : vector<1x256xf32> to vector<128x256xf32>
    %5 = arith.addf %2, %4 : vector<128x256xf32>
    %6 = arith.mulf %5, %5 : vector<128x256xf32>
    %cst_5 = arith.constant dense<0.000000e+00> : vector<128xf32>
    %7 = vector.multi_reduction <add>, %6, %cst_5 [1] : vector<128x256xf32> to vector<128xf32>
    %8 = vector.shape_cast %7 : vector<128xf32> to vector<128x1xf32>
    %cst_6 = arith.constant 1.000000e-24 : f32
    %9 = vector.broadcast %cst_6 : f32 to vector<128x1xf32>
    %10 = arith.maximumf %8, %9 : vector<128x1xf32>
    %11 = math.rsqrt %10 : vector<128x1xf32>
    %12 = vector.broadcast %11 : vector<128x1xf32> to vector<128x256xf32>
    %13 = arith.mulf %5, %12 : vector<128x256xf32>
    %14 = arith.truncf %13 : vector<128x256xf32> to vector<128x256xbf16>
    %c0_7 = arith.constant 0 : index
    %c0_8 = arith.constant 0 : index
    %15 = vector.load %arg4[%c0_7, %c0_8] : memref<128x256xbf16, #tpu.memory_space<vmem>>, vector<128x256xbf16>
    tpu.vector_store %arg4[%c0_7, %c0_8], %14 {strides = array<i32>} : memref<128x256xbf16, #tpu.memory_space<vmem>>, vector<128x256xbf16>,
    return
  }
  func.func @transform_0(%arg0: i32) -> (i32, i32) {
    %c0_i32 = arith.constant 0 : i32
    %c0_i32_0 = arith.constant 0 : i32
    return %arg0, %c0_i32 : i32, i32
  }
  func.func @transform_1(%arg0: i32) -> (i32, i32) {
    %c0_i32 = arith.constant 0 : i32
    %c0_i32_0 = arith.constant 0 : i32
    %c0_i32_1 = arith.constant 0 : i32
    return %c0_i32, %c0_i32_0 : i32, i32
  }
  func.func @transform_2(%arg0: i32) -> (i32, i32) {
    %c0_i32 = arith.constant 0 : i32
    %c0_i32_0 = arith.constant 0 : i32
    %c0_i32_1 = arith.constant 0 : i32
    return %c0_i32, %c0_i32_0 : i32, i32
  }
  func.func @transform_3(%arg0: i32) -> (i32, i32) {
    %c0_i32 = arith.constant 0 : i32
    %c0_i32_0 = arith.constant 0 : i32
    return %arg0, %c0_i32 : i32, i32
  }
}

module attributes {stable_mosaic.version = 11 : i64} {
  func.func @_similarity_kernel(%arg0: i32, %arg1: i32, %arg2: memref<8x256xbf16, #tpu.memory_space<vmem>>, %arg3: memref<128x256xbf16, #tpu.memory_space<vmem>>, %arg4: memref<8x128xf32, #tpu.memory_space<vmem>>) attributes {dimension_semantics = [#tpu.dimension_semantics<parallel>, #tpu.dimension_semantics<parallel>], iteration_bounds = array<i64: 1, 1>, scalar_prefetch = 0 : i64, scratch_operands = 0 : i64, tpu.core_type = #tpu.core_type<tc>, window_params = [{transform_indices = @transform_0, window_bounds = array<i64: 8, 256>}, {transform_indices = @transform_1, window_bounds = array<i64: 128, 256>}, {transform_indices = @transform_2, window_bounds = array<i64: 8, 128>}]} {
    %c0 = arith.constant 0 : index
    %c0_0 = arith.constant 0 : index
    %0 = vector.load %arg2[%c0, %c0_0] : memref<8x256xbf16, #tpu.memory_space<vmem>>, vector<8x256xbf16>
    %c0_1 = arith.constant 0 : index
    %c0_2 = arith.constant 0 : index
    %1 = vector.load %arg3[%c0_1, %c0_2] : memref<128x256xbf16, #tpu.memory_space<vmem>>, vector<128x256xbf16>
    %cst = arith.constant dense<0.000000e+00> : vector<8x128xf32>
    %2 = tpu.matmul %0, %1, %cst {dimension_numbers = #tpu.dot_dimension_numbers<[1], [1], [0], [0], [0, 0, 1, 0], [], []>} : vector<8x256xbf16>, vector<128x256xbf16>, vector<8x128xf32> -> vector<8x128xf32>
    %c0_3 = arith.constant 0 : index
    %c0_4 = arith.constant 0 : index
    %3 = vector.load %arg4[%c0_3, %c0_4] : memref<8x128xf32, #tpu.memory_space<vmem>>, vector<8x128xf32>
    tpu.vector_store %arg4[%c0_3, %c0_4], %2 {strides = array<i32>} : memref<8x128xf32, #tpu.memory_space<vmem>>, vector<8x128xf32>,
    return
  }
  func.func @transform_0(%arg0: i32, %arg1: i32) -> (i32, i32) {
    %c0_i32 = arith.constant 0 : i32
    %c0_i32_0 = arith.constant 0 : i32
    return %arg0, %c0_i32 : i32, i32
  }
  func.func @transform_1(%arg0: i32, %arg1: i32) -> (i32, i32) {
    %c0_i32 = arith.constant 0 : i32
    %c0_i32_0 = arith.constant 0 : i32
    return %arg1, %c0_i32 : i32, i32
  }
  func.func @transform_2(%arg0: i32, %arg1: i32) -> (i32, i32) {
    %c0_i32 = arith.constant 0 : i32
    return %arg0, %arg1 : i32, i32
  }
}

module attributes {stable_mosaic.version = 11 : i64} {
  func.func @_encode_kernel(%arg0: i32, %arg1: memref<8x768xbf16, #tpu.memory_space<vmem>>, %arg2: memref<768x256xbf16, #tpu.memory_space<vmem>>, %arg3: memref<1x256xf32, #tpu.memory_space<vmem>>, %arg4: memref<8x256xbf16, #tpu.memory_space<vmem>>) attributes {dimension_semantics = [#tpu.dimension_semantics<parallel>], iteration_bounds = array<i64: 1>, scalar_prefetch = 0 : i64, scratch_operands = 0 : i64, tpu.core_type = #tpu.core_type<tc>, window_params = [{transform_indices = @transform_0, window_bounds = array<i64: 8, 768>}, {pipeline_mode = #tpu.pipeline_mode<synchronous>, transform_indices = @transform_1, window_bounds = array<i64: 768, 256>}, {pipeline_mode = #tpu.pipeline_mode<synchronous>, transform_indices = @transform_2, window_bounds = array<i64: 1, 256>}, {transform_indices = @transform_3, window_bounds = array<i64: 8, 256>}]} {
    %c0 = arith.constant 0 : index
    %c0_0 = arith.constant 0 : index
    %0 = vector.load %arg1[%c0, %c0_0] : memref<8x768xbf16, #tpu.memory_space<vmem>>, vector<8x768xbf16>
    %c0_1 = arith.constant 0 : index
    %c0_2 = arith.constant 0 : index
    %1 = vector.load %arg2[%c0_1, %c0_2] : memref<768x256xbf16, #tpu.memory_space<vmem>>, vector<768x256xbf16>
    %cst = arith.constant dense<0.000000e+00> : vector<8x256xf32>
    %2 = tpu.matmul %0, %1, %cst {dimension_numbers = #tpu.dot_dimension_numbers<[1], [0], [0], [1], [0, 0, 1, 1], [], []>} : vector<8x768xbf16>, vector<768x256xbf16>, vector<8x256xf32> -> vector<8x256xf32>
    %c0_3 = arith.constant 0 : index
    %c0_4 = arith.constant 0 : index
    %3 = vector.load %arg3[%c0_3, %c0_4] : memref<1x256xf32, #tpu.memory_space<vmem>>, vector<1x256xf32>
    %4 = vector.broadcast %3 : vector<1x256xf32> to vector<8x256xf32>
    %5 = arith.addf %2, %4 : vector<8x256xf32>
    %6 = arith.mulf %5, %5 : vector<8x256xf32>
    %cst_5 = arith.constant dense<0.000000e+00> : vector<8xf32>
    %7 = vector.multi_reduction <add>, %6, %cst_5 [1] : vector<8x256xf32> to vector<8xf32>
    %8 = vector.shape_cast %7 : vector<8xf32> to vector<8x1xf32>
    %cst_6 = arith.constant 1.000000e-24 : f32
    %9 = vector.broadcast %cst_6 : f32 to vector<8x1xf32>
    %10 = arith.maximumf %8, %9 : vector<8x1xf32>
    %11 = math.rsqrt %10 : vector<8x1xf32>
    %12 = vector.broadcast %11 : vector<8x1xf32> to vector<8x256xf32>
    %13 = arith.mulf %5, %12 : vector<8x256xf32>
    %14 = arith.truncf %13 : vector<8x256xf32> to vector<8x256xbf16>
    %c0_7 = arith.constant 0 : index
    %c0_8 = arith.constant 0 : index
    %15 = vector.load %arg4[%c0_7, %c0_8] : memref<8x256xbf16, #tpu.memory_space<vmem>>, vector<8x256xbf16>
    tpu.vector_store %arg4[%c0_7, %c0_8], %14 {strides = array<i32>} : memref<8x256xbf16, #tpu.memory_space<vmem>>, vector<8x256xbf16>,
    return
  }
  func.func @transform_0(%arg0: i32) -> (i32, i32) {
    %c0_i32 = arith.constant 0 : i32
    %c0_i32_0 = arith.constant 0 : i32
    return %arg0, %c0_i32 : i32, i32
  }
  func.func @transform_1(%arg0: i32) -> (i32, i32) {
    %c0_i32 = arith.constant 0 : i32
    %c0_i32_0 = arith.constant 0 : i32
    %c0_i32_1 = arith.constant 0 : i32
    return %c0_i32, %c0_i32_0 : i32, i32
  }
  func.func @transform_2(%arg0: i32) -> (i32, i32) {
    %c0_i32 = arith.constant 0 : i32
    %c0_i32_0 = arith.constant 0 : i32
    %c0_i32_1 = arith.constant 0 : i32
    return %c0_i32, %c0_i32_0 : i32, i32
  }
  func.func @transform_3(%arg0: i32) -> (i32, i32) {
    %c0_i32 = arith.constant 0 : i32
    %c0_i32_0 = arith.constant 0 : i32
    return %arg0, %c0_i32 : i32, i32
  }
}

</mosaic_0001>

<bundles_post_ra>
// kernel: semantic_search_forward.5
= control target key start
LH: loop header
LB: loop body
LE: loop exit
PB: predicated region body
PF: predicated region fallthrough
CT: control target
= control target key end

     0   :  { %s274_s1 = inlined_call_operand.vmem [shape: bf16[128,256], index: 1, kind: input, shape index: {}]   ;;  %s275_s0 = inlined_call_operand.vmem [shape: bf16[8,256], index: 0, kind: input, shape index: {}]   ;;  %s276_s2 = inlined_call_operand.vmem [shape: f32[8,128], index: 2, kind: output, shape index: {}]  }
   0x1   :  { %v179_v0 = vld [vmem:[%s274_s1 + $0x4] ss:$8 sps:$4 sm:$0xff]   ;;  %v181_v1 = vld [vmem:[%s274_s1] ss:$8 sps:$4 sm:$0xff]   ;;  %v182_v2 = vld [vmem:[%s274_s1 + $0x14] ss:$8 sps:$4 sm:$0xff]  }
   0x2   :  { %116 = vmatprep.subr.bf16.mxu0 %v179_v0  ;;  %v184_v3 = vld [vmem:[%s274_s1 + $0x10] ss:$8 sps:$4 sm:$0xff]   ;;  %v185_v4 = vld [vmem:[%s274_s1 + $0x24] ss:$8 sps:$4 sm:$0xff]   ;;  %v187_v7 = vld [vmem:[%s274_s1 + $0x20] ss:$8 sps:$4 sm:$0xff]  }
   0x3   :  { %117 = vmatpush1.bf16.xpose.msra.mxu0 %v181_v1  ;;  %v12_v5 = vld [vmem:[%s275_s0] sm:$0xff]  ;;  %v188_v8 = vld [vmem:[%s274_s1 + $0x34] ss:$8 sps:$4 sm:$0xff]   ;;  %v190_v9 = vld [vmem:[%s274_s1 + $0x30] ss:$8 sps:$4 sm:$0xff]  }
   0x4   :  { %118 = vmatprep.subr.bf16.mxu0 %v182_v2  ;;  %v162_v6 = vcombine.high %v12_v5, %v12_v5  ;;  %v191_v10 = vld [vmem:[%s274_s1 + $0x44] ss:$8 sps:$4 sm:$0xff]   ;;  %v193_v11 = vld [vmem:[%s274_s1 + $0x40] ss:$8 sps:$4 sm:$0xff]   ;;  %v194_v12 = vld [vmem:[%s274_s1 + $0x54] ss:$8 sps:$4 sm:$0xff]   ;;  %v161_v18 = vcombine.low %v12_v5, %v12_v5 }
   0x5   :  { %v196_v13 = vld [vmem:[%s274_s1 + $0x50] ss:$8 sps:$4 sm:$0xff]   ;;  %v197_v14 = vld [vmem:[%s274_s1 + $0x64] ss:$8 sps:$4 sm:$0xff]   ;;  %v199_v15 = vld [vmem:[%s274_s1 + $0x60] ss:$8 sps:$4 sm:$0xff]  }
   0x6   :  { %148 = vmatprep.mubr.bf16.mxu0 %v162_v6  ;;  %v200_v16 = vld [vmem:[%s274_s1 + $0x74] ss:$8 sps:$4 sm:$0xff]   ;;  %v202_v17 = vld [vmem:[%s274_s1 + $0x70] ss:$8 sps:$4 sm:$0xff]  }
   0xb   :  { %119 = vmatpush1.bf16.xpose.msra.mxu0 %v184_v3 }
   0xc   :  { %120 = vmatprep.subr.bf16.mxu0 %v185_v4 }
  0x13   :  { %121 = vmatpush1.bf16.xpose.msra.mxu0 %v187_v7 }
  0x14   :  { %122 = vmatprep.subr.bf16.mxu0 %v188_v8 }
  0x1b   :  { %123 = vmatpush1.bf16.xpose.msra.mxu0 %v190_v9 }
  0x1c   :  { %124 = vmatprep.subr.bf16.mxu0 %v191_v10 }
  0x23   :  { %125 = vmatpush1.bf16.xpose.msra.mxu0 %v193_v11 }
  0x24   :  { %126 = vmatprep.subr.bf16.mxu0 %v194_v12 }
  0x2b   :  { %127 = vmatpush1.bf16.xpose.msra.mxu0 %v196_v13 }
  0x2c   :  { %128 = vmatprep.subr.bf16.mxu0 %v197_v14 }
  0x33   :  { %129 = vmatpush1.bf16.xpose.msra.mxu0 %v199_v15 }
  0x34   :  { %130 = vmatprep.subr.bf16.mxu0 %v200_v16 }
  0x3b   :  { %131 = vmatpush1.bf16.xpose.msra.mxu0 %v202_v17 }
  0x42   :  { %149 = vmatmul.mubr.bf16.vlgmr.msra.gmra.mrb[0].mxu0 %v161_v18 }
 0x115   :  { %v150_v19 = vpop.f32.mrb[0].mxu0 }
 0x116   :  { %156 = vst [vmem:[%s276_s2] sm:$0xff] %v150_v19  ;;  %v152_v20 = vpop.f32.mrb[1].mxu0 }
 0x117   :  { %v153_v21 = vpop.f32.mrb[2].mxu0 }
 0x118   :  { %v154_v22 = vpop.f32.mrb[3].mxu0 }

// kernel: semantic_search_forward.3
= control target key start
LH: loop header
LB: loop body
LE: loop exit
PB: predicated region body
PF: predicated region fallthrough
CT: control target
= control target key end

     0   :  { %s1370_s1 = inlined_call_operand.vmem [shape: bf16[768,256], index: 1, kind: input, shape index: {}]   ;;  %s1371_s0 = inlined_call_operand.vmem [shape: bf16[8,768], index: 0, kind: input, shape index: {}]   ;;  %s1372_s2 = inlined_call_operand.vmem [shape: f32[1,256], index: 2, kind: input, shape index: {}]   ;;  %s1373_s3 = inlined_call_operand.vmem [shape: bf16[8,256], index: 3, kind: output, shape index: {}]  }
   0x1   :  { %v883_v0 = vld [vmem:[%s1370_s1 + $0x104] ss:$8 sps:$4 sm:$0xff]   ;;  %v885_v1 = vld [vmem:[%s1370_s1 + $0x100] ss:$8 sps:$4 sm:$0xff]   ;;  %v886_v2 = vld [vmem:[%s1370_s1 + $0x114] ss:$8 sps:$4 sm:$0xff]  }
   0x2   :  { %667 = vmatprep.subr.bf16.mxu0 %v883_v0  ;;  %v888_v3 = vld [vmem:[%s1370_s1 + $0x110] ss:$8 sps:$4 sm:$0xff]   ;;  %v889_v4 = vld [vmem:[%s1370_s1 + $0x124] ss:$8 sps:$4 sm:$0xff]   ;;  %v891_v5 = vld [vmem:[%s1370_s1 + $0x120] ss:$8 sps:$4 sm:$0xff]  }
   0x3   :  { %668 = vmatpush1.bf16.msra.mxu0 %v885_v1  ;;  %v892_v6 = vld [vmem:[%s1370_s1 + $0x134] ss:$8 sps:$4 sm:$0xff]   ;;  %v894_v7 = vld [vmem:[%s1370_s1 + $0x130] ss:$8 sps:$4 sm:$0xff]   ;;  %v895_v8 = vld [vmem:[%s1370_s1 + $0x144] ss:$8 sps:$4 sm:$0xff]  }
   0x4   :  { %669 = vmatprep.subr.bf16.mxu0 %v886_v2  ;;  %v897_v9 = vld [vmem:[%s1370_s1 + $0x140] ss:$8 sps:$4 sm:$0xff]   ;;  %v898_v10 = vld [vmem:[%s1370_s1 + $0x154] ss:$8 sps:$4 sm:$0xff]   ;;  %v900_v11 = vld [vmem:[%s1370_s1 + $0x150] ss:$8 sps:$4 sm:$0xff]  }
   0x5   :  { %v901_v12 = vld [vmem:[%s1370_s1 + $0x164] ss:$8 sps:$4 sm:$0xff]   ;;  %v930_v14 = vld [vmem:[%s1370_s1] ss:$8 sps:$4 sm:$0xff]   ;;  %v904_v16 = vld [vmem:[%s1370_s1 + $0x174] ss:$8 sps:$4 sm:$0xff]  }
   0x6   :  { %v928_v13 = vld [vmem:[%s1370_s1 + $0x4] ss:$8 sps:$4 sm:$0xff]   ;;  %v903_v15 = vld [vmem:[%s1370_s1 + $0x160] ss:$8 sps:$4 sm:$0xff]   ;;  %v934_v17 = vld [vmem:[%s1370_s1 + $0x14] ss:$8 sps:$4 sm:$0xff]  }
   0x7   :  { %670 = vmatpush1.bf16.msra.mxu0 %v888_v3  ;;  %626 = vmatprep.subr.bf16.mxu1 %v928_v13  ;;  %v936_v18 = vld [vmem:[%s1370_s1 + $0x10] ss:$8 sps:$4 sm:$0xff]   ;;  %v1115_v19 = vld [vmem:[%s1371_s0 + $0x8] sm:$0xff]  ;;  %v948_v25 = vld [vmem:[%s1370_s1 + $0x34] ss:$8 sps:$4 sm:$0xff]  }
   0x8   :  { %671 = vmatprep.subr.bf16.mxu0 %v889_v4  ;;  %627 = vmatpush1.bf16.msra.mxu1 %v930_v14  ;;  %v774_v20 = vcombine.high %v1115_v19, %v1115_v19  ;;  %v906_v21 = vld [vmem:[%s1370_s1 + $0x170] ss:$8 sps:$4 sm:$0xff]   ;;  %v942_v22 = vld [vmem:[%s1370_s1 + $0x24] ss:$8 sps:$4 sm:$0xff]   ;;  %v944_v23 = vld [vmem:[%s1370_s1 + $0x20] ss:$8 sps:$4 sm:$0xff]   ;;  %v773_v58 = vcombine.low %v1115_v19, %v1115_v19 }
   0x9   :  { %628 = vmatprep.subr.bf16.mxu1 %v934_v17  ;;  %v907_v24 = vld [vmem:[%s1370_s1 + $0x184] ss:$8 sps:$4 sm:$0xff]   ;;  %v909_v26 = vld [vmem:[%s1370_s1 + $0x180] ss:$8 sps:$4 sm:$0xff]   ;;  %v910_v27 = vld [vmem:[%s1370_s1 + $0x194] ss:$8 sps:$4 sm:$0xff]  }
   0xa   :  { %699 = vmatprep.mubr.bf16.mxu0 %v774_v20  ;;  %v950_v28 = vld [vmem:[%s1370_s1 + $0x30] ss:$8 sps:$4 sm:$0xff]   ;;  %v954_v29 = vld [vmem:[%s1370_s1 + $0x44] ss:$8 sps:$4 sm:$0xff]   ;;  %v956_v32 = vld [vmem:[%s1370_s1 + $0x40] ss:$8 sps:$4 sm:$0xff]  }
   0xb   :  { %672 = vmatpush1.bf16.msra.mxu0 %v891_v5  ;;  %v912_v30 = vld [vmem:[%s1370_s1 + $0x190] ss:$8 sps:$4 sm:$0xff]   ;;  %v913_v31 = vld [vmem:[%s1370_s1 + $0x1a4] ss:$8 sps:$4 sm:$0xff]   ;;  %v960_v33 = vld [vmem:[%s1370_s1 + $0x54] ss:$8 sps:$4 sm:$0xff]  }
   0xc   :  { %673 = vmatprep.subr.bf16.mxu0 %v892_v6  ;;  %629 = vmatpush1.bf16.msra.mxu1 %v936_v18  ;;  %v915_v34 = vld [vmem:[%s1370_s1 + $0x1a0] ss:$8 sps:$4 sm:$0xff]   ;;  %v916_v35 = vld [vmem:[%s1370_s1 + $0x1b4] ss:$8 sps:$4 sm:$0xff]   ;;  %v962_v36 = vld [vmem:[%s1370_s1 + $0x50] ss:$8 sps:$4 sm:$0xff]  }
   0xd   :  { %630 = vmatprep.subr.bf16.mxu1 %v942_v22  ;;  %v966_v37 = vld [vmem:[%s1370_s1 + $0x64] ss:$8 sps:$4 sm:$0xff]   ;;  %v918_v38 = vld [vmem:[%s1370_s1 + $0x1b0] ss:$8 sps:$4 sm:$0xff]   ;;  %v968_v40 = vld [vmem:[%s1370_s1 + $0x60] ss:$8 sps:$4 sm:$0xff]  }
   0xe   :  { %v919_v39 = vld [vmem:[%s1370_s1 + $0x1c4] ss:$8 sps:$4 sm:$0xff]   ;;  %v972_v41 = vld [vmem:[%s1370_s1 + $0x74] ss:$8 sps:$4 sm:$0xff]   ;;  %v921_v42 = vld [vmem:[%s1370_s1 + $0x1c0] ss:$8 sps:$4 sm:$0xff]  }
   0xf   :  { %674 = vmatpush1.bf16.msra.mxu0 %v894_v7  ;;  %v922_v43 = vld [vmem:[%s1370_s1 + $0x1d4] ss:$8 sps:$4 sm:$0xff]   ;;  %v974_v44 = vld [vmem:[%s1370_s1 + $0x70] ss:$8 sps:$4 sm:$0xff]   ;;  %v978_v45 = vld [vmem:[%s1370_s1 + $0x84] ss:$8 sps:$4 sm:$0xff]  }
  0x10   :  { %675 = vmatprep.subr.bf16.mxu0 %v895_v8  ;;  %631 = vmatpush1.bf16.msra.mxu1 %v944_v23  ;;  %v924_v46 = vld [vmem:[%s1370_s1 + $0x1d0] ss:$8 sps:$4 sm:$0xff]   ;;  %v925_v47 = vld [vmem:[%s1370_s1 + $0x1e4] ss:$8 sps:$4 sm:$0xff]   ;;  %v980_v48 = vld [vmem:[%s1370_s1 + $0x80] ss:$8 sps:$4 sm:$0xff]  }
  0x11   :  { %632 = vmatprep.subr.bf16.mxu1 %v948_v25  ;;  %v984_v49 = vld [vmem:[%s1370_s1 + $0x94] ss:$8 sps:$4 sm:$0xff]   ;;  %v927_v50 = vld [vmem:[%s1370_s1 + $0x1e0] ss:$8 sps:$4 sm:$0xff]   ;;  %v986_v52 = vld [vmem:[%s1370_s1 + $0x90] ss:$8 sps:$4 sm:$0xff]  }
  0x12   :  { %v931_v51 = vld [vmem:[%s1370_s1 + $0x1f4] ss:$8 sps:$4 sm:$0xff]   ;;  %v990_v53 = vld [vmem:[%s1370_s1 + $0xa4] ss:$8 sps:$4 sm:$0xff]   ;;  %v933_v54 = vld [vmem:[%s1370_s1 + $0x1f0] ss:$8 sps:$4 sm:$0xff]  }
  0x13   :  { %676 = vmatpush1.bf16.msra.mxu0 %v897_v9  ;;  %v941_v55 = vld [vmem:[%s1370_s1 + $0x204] ss:$8 sps:$4 sm:$0xff]   ;;  %v992_v56 = vld [vmem:[%s1370_s1 + $0xa0] ss:$8 sps:$4 sm:$0xff]   ;;  %v996_v57 = vld [vmem:[%s1370_s1 + $0xb4] ss:$8 sps:$4 sm:$0xff]  }
  0x14   :  { %677 = vmatprep.subr.bf16.mxu0 %v898_v10  ;;  %633 = vmatpush1.bf16.msra.mxu1 %v950_v28  ;;  %v939_v59 = vld [vmem:[%s1370_s1 + $0x200] ss:$8 sps:$4 sm:$0xff]   ;;  %v998_v60 = vld [vmem:[%s1370_s1 + $0xb0] ss:$8 sps:$4 sm:$0xff]   ;;  %v947_v62 = vld [vmem:[%s1370_s1 + $0x214] ss:$8 sps:$4 sm:$0xff]  }
  0x15   :  { %634 = vmatprep.subr.bf16.mxu1 %v954_v29  ;;  %v14_v61 = vld [vmem:[%s1371_s0] sm:$0xff]  ;;  %v1250_v1 = vld [vmem:[%s1371_s0 + $0x10] sm:$0xff] }
  0x16   :  { %v1002_v63 = vld [vmem:[%s1370_s1 + $0xc4] ss:$8 sps:$4 sm:$0xff]   ;;  %v772_v0 = vcombine.high %v14_v61, %v14_v61  ;;  %v776_v2 = vcombine.high %v1250_v1, %v1250_v1  ;;  %v945_v3 = vld [vmem:[%s1370_s1 + $0x210] ss:$8 sps:$4 sm:$0xff]   ;;  %v1004_v4 = vld [vmem:[%s1370_s1 + $0xc0] ss:$8 sps:$4 sm:$0xff]   ;;  %v771_v18 = vcombine.low %v14_v61, %v14_v61 }
  0x17   :  { %678 = vmatpush1.bf16.msra.mxu0 %v900_v11  ;;  %v953_v5 = vld [vmem:[%s1370_s1 + $0x224] ss:$8 sps:$4 sm:$0xff]   ;;  %v1008_v6 = vld [vmem:[%s1370_s1 + $0xd4] ss:$8 sps:$4 sm:$0xff]   ;;  %v951_v7 = vld [vmem:[%s1370_s1 + $0x220] ss:$8 sps:$4 sm:$0xff]  }
  0x18   :  { %679 = vmatprep.subr.bf16.mxu0 %v901_v12  ;;  %635 = vmatpush1.bf16.msra.mxu1 %v956_v32  ;;  %v1010_v8 = vld [vmem:[%s1370_s1 + $0xd0] ss:$8 sps:$4 sm:$0xff]   ;;  %v959_v9 = vld [vmem:[%s1370_s1 + $0x234] ss:$8 sps:$4 sm:$0xff]   ;;  %v1014_v10 = vld [vmem:[%s1370_s1 + $0xe4] ss:$8 sps:$4 sm:$0xff]  }
  0x19   :  { %636 = vmatprep.subr.bf16.mxu1 %v960_v33  ;;  %658 = vmatprep.mubr.bf16.mxu1 %v772_v0  ;;  %v957_v11 = vld [vmem:[%s1370_s1 + $0x230] ss:$8 sps:$4 sm:$0xff]   ;;  %v1016_v12 = vld [vmem:[%s1370_s1 + $0xe0] ss:$8 sps:$4 sm:$0xff]   ;;  %v965_v13 = vld [vmem:[%s1370_s1 + $0x244] ss:$8 sps:$4 sm:$0xff]  }
  0x1a   :  { %v1020_v14 = vld [vmem:[%s1370_s1 + $0xf4] ss:$8 sps:$4 sm:$0xff]   ;;  %v969_v19 = vld [vmem:[%s1370_s1 + $0x250] ss:$8 sps:$4 sm:$0xff]   ;;  %v977_v20 = vld [vmem:[%s1370_s1 + $0x264] ss:$8 sps:$4 sm:$0xff]  }
  0x1b   :  { %680 = vmatpush1.bf16.msra.mxu0 %v903_v15  ;;  %v963_v15 = vld [vmem:[%s1370_s1 + $0x240] ss:$8 sps:$4 sm:$0xff]   ;;  %v971_v17 = vld [vmem:[%s1370_s1 + $0x254] ss:$8 sps:$4 sm:$0xff]   ;;  %v981_v23 = vld [vmem:[%s1370_s1 + $0x270] ss:$8 sps:$4 sm:$0xff]  }
  0x1c   :  { %681 = vmatprep.subr.bf16.mxu0 %v904_v16  ;;  %637 = vmatpush1.bf16.msra.mxu1 %v962_v36  ;;  %v1022_v16 = vld [vmem:[%s1370_s1 + $0xf0] ss:$8 sps:$4 sm:$0xff]   ;;  %v983_v22 = vld [vmem:[%s1370_s1 + $0x274] ss:$8 sps:$4 sm:$0xff]   ;;  %v987_v25 = vld [vmem:[%s1370_s1 + $0x280] ss:$8 sps:$4 sm:$0xff]  }
  0x1d   :  { %638 = vmatprep.subr.bf16.mxu1 %v966_v37  ;;  %v1001_v28 = vld [vmem:[%s1370_s1 + $0x2a4] ss:$8 sps:$4 sm:$0xff]   ;;  %v999_v29 = vld [vmem:[%s1370_s1 + $0x2a0] ss:$8 sps:$4 sm:$0xff]  }
  0x1e   :  { %v1013_v32 = vld [vmem:[%s1370_s1 + $0x2c4] ss:$8 sps:$4 sm:$0xff]   ;;  %v1011_v33 = vld [vmem:[%s1370_s1 + $0x2c0] ss:$8 sps:$4 sm:$0xff]  }
  0x1f   :  { %682 = vmatpush1.bf16.msra.mxu0 %v906_v21  ;;  %v975_v21 = vld [vmem:[%s1370_s1 + $0x260] ss:$8 sps:$4 sm:$0xff]   ;;  %v1025_v36 = vld [vmem:[%s1370_s1 + $0x2e4] ss:$8 sps:$4 sm:$0xff]  }
  0x20   :  { %683 = vmatprep.subr.bf16.mxu0 %v907_v24  ;;  %639 = vmatpush1.bf16.msra.mxu1 %v968_v40  ;;  %v989_v24 = vld [vmem:[%s1370_s1 + $0x284] ss:$8 sps:$4 sm:$0xff]   ;;  %v1023_v37 = vld [vmem:[%s1370_s1 + $0x2e0] ss:$8 sps:$4 sm:$0xff]   ;;  %v775_v40 = vcombine.low %v1250_v1, %v1250_v1 }
  0x21   :  { %640 = vmatprep.subr.bf16.mxu1 %v972_v41 }
  0x23   :  { %684 = vmatpush1.bf16.msra.mxu0 %v909_v26  ;;  %v995_v26 = vld [vmem:[%s1370_s1 + $0x294] ss:$8 sps:$4 sm:$0xff]  }
  0x24   :  { %685 = vmatprep.subr.bf16.mxu0 %v910_v27  ;;  %641 = vmatpush1.bf16.msra.mxu1 %v974_v44  ;;  %v993_v27 = vld [vmem:[%s1370_s1 + $0x290] ss:$8 sps:$4 sm:$0xff]  }
  0x25   :  { %642 = vmatprep.subr.bf16.mxu1 %v978_v45  ;;  %v115_v45 = vlaneseq }
  0x27   :  { %686 = vmatpush1.bf16.msra.mxu0 %v912_v30  ;;  %v1007_v30 = vld [vmem:[%s1370_s1 + $0x2b4] ss:$8 sps:$4 sm:$0xff]  }
  0x28   :  { %687 = vmatprep.subr.bf16.mxu0 %v913_v31  ;;  %643 = vmatpush1.bf16.msra.mxu1 %v980_v48  ;;  %v1005_v31 = vld [vmem:[%s1370_s1 + $0x2b0] ss:$8 sps:$4 sm:$0xff]   ;;  %v113_v48 = vld [vmem:[%s1372_s2] sm:$0x3] }
  0x29   :  { %644 = vmatprep.subr.bf16.mxu1 %v984_v49 }
  0x2b   :  { %688 = vmatpush1.bf16.msra.mxu0 %v915_v34  ;;  %v1019_v34 = vld [vmem:[%s1370_s1 + $0x2d4] ss:$8 sps:$4 sm:$0xff]  }
  0x2c   :  { %689 = vmatprep.subr.bf16.mxu0 %v916_v35  ;;  %645 = vmatpush1.bf16.msra.mxu1 %v986_v52  ;;  %v1017_v35 = vld [vmem:[%s1370_s1 + $0x2d0] ss:$8 sps:$4 sm:$0xff]  }
  0x2d   :  { %646 = vmatprep.subr.bf16.mxu1 %v990_v53 }
  0x2f   :  { %690 = vmatpush1.bf16.msra.mxu0 %v918_v38  ;;  %v1030_v38 = vld [vmem:[%s1370_s1 + $0x2f4] ss:$8 sps:$4 sm:$0xff]  }
  0x30   :  { %691 = vmatprep.subr.bf16.mxu0 %v919_v39  ;;  %647 = vmatpush1.bf16.msra.mxu1 %v992_v56  ;;  %v1028_v39 = vld [vmem:[%s1370_s1 + $0x2f0] ss:$8 sps:$4 sm:$0xff]  }
  0x31   :  { %648 = vmatprep.subr.bf16.mxu1 %v996_v57 }
  0x33   :  { %692 = vmatpush1.bf16.msra.mxu0 %v921_v42 }
  0x34   :  { %693 = vmatprep.subr.bf16.mxu0 %v922_v43  ;;  %649 = vmatpush1.bf16.msra.mxu1 %v998_v60 }
  0x35   :  { %650 = vmatprep.subr.bf16.mxu1 %v1002_v63 }
  0x37   :  { %694 = vmatpush1.bf16.msra.mxu0 %v924_v46  ;;  %v116_v46 = vshrl.u32 %v115_v45, 7 }
  0x38   :  { %695 = vmatprep.subr.bf16.mxu0 %v925_v47  ;;  %651 = vmatpush1.bf16.msra.mxu1 %v1004_v4 }
  0x39   :  { %652 = vmatprep.subr.bf16.mxu1 %v1008_v6  ;;  %v117_v47 = vsub.s32 0, %v116_v46  ;;  %v121_v49 = vsub.s32 1, %v116_v46 }
  0x3b   :  { %696 = vmatpush1.bf16.msra.mxu0 %v927_v50  ;;  %v118_v50 = vrot.slane %v113_v48, %v117_v47 }
  0x3c   :  { %697 = vmatprep.subr.bf16.mxu0 %v931_v51  ;;  %653 = vmatpush1.bf16.msra.mxu1 %v1010_v8  ;;  %v122_v51 = vrot.slane %v113_v48, %v121_v49 }
  0x3d   :  { %654 = vmatprep.subr.bf16.mxu1 %v1014_v10 }
  0x3f   :  { %698 = vmatpush1.bf16.msra.mxu0 %v933_v54 }
  0x40   :  { %708 = vmatprep.subr.bf16.mxu0 %v941_v55  ;;  %655 = vmatpush1.bf16.msra.mxu1 %v1016_v12 }
  0x41   :  { %656 = vmatprep.subr.bf16.mxu1 %v1020_v14 }
  0x42   :  { %700 = vmatmul.mubr.bf16.vlgmr.msra.gmra.mrb[0].mxu0 %v773_v58 }
  0x43   :  { %709 = vmatpush1.bf16.msra.mxu0 %v939_v59  ;;  %740 = vmatprep.mubr.bf16.mxu0 %v776_v2 }
  0x44   :  { %710 = vmatprep.subr.bf16.mxu0 %v947_v62  ;;  %657 = vmatpush1.bf16.msra.mxu1 %v1022_v16 }
  0x47   :  { %711 = vmatpush1.bf16.msra.mxu0 %v945_v3  ;;  %659 = vmatmul.mubr.bf16.vlgmr.msra.gmra.mrb[0].mxu1 %v771_v18 }
  0x48   :  { %712 = vmatprep.subr.bf16.mxu0 %v953_v5 }
  0x4b   :  { %713 = vmatpush1.bf16.msra.mxu0 %v951_v7 }
  0x4c   :  { %714 = vmatprep.subr.bf16.mxu0 %v959_v9 }
  0x4f   :  { %715 = vmatpush1.bf16.msra.mxu0 %v957_v11 }
  0x50   :  { %716 = vmatprep.subr.bf16.mxu0 %v965_v13 }
  0x53   :  { %717 = vmatpush1.bf16.msra.mxu0 %v963_v15 }
  0x54   :  { %718 = vmatprep.subr.bf16.mxu0 %v971_v17 }
  0x57   :  { %719 = vmatpush1.bf16.msra.mxu0 %v969_v19 }
  0x58   :  { %720 = vmatprep.subr.bf16.mxu0 %v977_v20 }
  0x5b   :  { %721 = vmatpush1.bf16.msra.mxu0 %v975_v21 }
  0x5c   :  { %722 = vmatprep.subr.bf16.mxu0 %v983_v22 }
  0x5f   :  { %723 = vmatpush1.bf16.msra.mxu0 %v981_v23 }
  0x60   :  { %724 = vmatprep.subr.bf16.mxu0 %v989_v24 }
  0x63   :  { %725 = vmatpush1.bf16.msra.mxu0 %v987_v25 }
  0x64   :  { %726 = vmatprep.subr.bf16.mxu0 %v995_v26 }
  0x67   :  { %727 = vmatpush1.bf16.msra.mxu0 %v993_v27 }
  0x68   :  { %728 = vmatprep.subr.bf16.mxu0 %v1001_v28 }
  0x6b   :  { %729 = vmatpush1.bf16.msra.mxu0 %v999_v29 }
  0x6c   :  { %730 = vmatprep.subr.bf16.mxu0 %v1007_v30 }
  0x6f   :  { %731 = vmatpush1.bf16.msra.mxu0 %v1005_v31 }
  0x70   :  { %732 = vmatprep.subr.bf16.mxu0 %v1013_v32 }
  0x73   :  { %733 = vmatpush1.bf16.msra.mxu0 %v1011_v33 }
  0x74   :  { %734 = vmatprep.subr.bf16.mxu0 %v1019_v34 }
  0x77   :  { %735 = vmatpush1.bf16.msra.mxu0 %v1017_v35 }
  0x78   :  { %736 = vmatprep.subr.bf16.mxu0 %v1025_v36 }
  0x7b   :  { %737 = vmatpush1.bf16.msra.mxu0 %v1023_v37 }
  0x7c   :  { %738 = vmatprep.subr.bf16.mxu0 %v1030_v38 }
  0x7f   :  { %739 = vmatpush1.bf16.msra.mxu0 %v1028_v39 }
  0x82   :  { %741 = vmatmul.mubr.bf16.vlgmr.msra.gmra.mrb[0].mxu0 %v775_v40 }
 0x11a   :  { %v660_v41 = vpop.f32.mrb[0].mxu1 }
 0x11b   :  { %v662_v42 = vpop.f32.mrb[1].mxu1  ;;  %v661_v52 = vadd.f32 %v660_v41, %v118_v50 }
 0x11c   :  { %v664_v43 = vpop.f32.mrb[2].mxu1  ;;  %v663_v53 = vadd.f32 %v662_v42, %v122_v51 }
 0x11d   :  { %v665_v44 = vpop.f32.mrb[3].mxu1 }
 0x155   :  { %v742_v54 = vpop.f32.mrb[0].mxu0 }
 0x156   :  { %v876_v55 = vadd.f32 %v742_v54, %v661_v52  ;;  %v744_v56 = vpop.f32.mrb[1].mxu0 }
 0x157   :  { %v878_v57 = vadd.f32 %v744_v56, %v663_v53  ;;  %v746_v58 = vpop.f32.mrb[2].mxu0 }
 0x158   :  { %v747_v59 = vpop.f32.mrb[3].mxu0  ;;  %v749_v60 = vmul.f32 %v876_v55, %v876_v55 }
 0x159   :  { %v750_v61 = vmul.f32 %v878_v57, %v878_v57 }
 0x15b   :  { %v751_v62 = vadd.f32 %v750_v61, %v749_v60 }
 0x15d   :  { %752 = vadd.xlane.f32.xlu0 %v751_v62 }
 0x1ea   :  { %v753_v63 = vpop.xlane.xlu0 %752 }
 0x1eb   :  { %v754_v0 = vmax.f32 %v753_v63, 1e-24 }
 0x1ed   :  { %1033 = vrsqrt.f32 %v754_v0 }
 0x1f7   :  { %v1034_v1 = vpop.eup %1033 }
 0x1f8   :  { %v756_v2 = vmul.f32 %v1034_v1, %v876_v55  ;;  %v757_v3 = vmul.f32 %v1034_v1, %v878_v57 }
 0x1fa   :  { %v874_v4 = vpack.c.bf16 %v757_v3, %v756_v2 }
 0x1fc   :  { %766 = vst [vmem:[%s1373_s3] sm:$0xff] %v874_v4 }

// kernel: semantic_search_forward.4
= control target key start
LH: loop header
LB: loop body
LE: loop exit
PB: predicated region body
PF: predicated region fallthrough
CT: control target
= control target key end

     0   :  { %s2833_s1 = inlined_call_operand.vmem [shape: bf16[768,256], index: 1, kind: input, shape index: {}]   ;;  %s2834_s0 = inlined_call_operand.vmem [shape: bf16[128,768], index: 0, kind: input, shape index: {}]   ;;  %s2835_s2 = inlined_call_operand.vmem [shape: f32[1,256], index: 2, kind: input, shape index: {}]   ;;  %s2836_s3 = inlined_call_operand.vmem [shape: bf16[128,256], index: 3, kind: output, shape index: {}]  }
   0x1   :  { %v1793_v0 = vld [vmem:[%s2833_s1 + $0x4] ss:$8 sps:$4 sm:$0xff]   ;;  %v1797_v2 = vld [vmem:[%s2833_s1] ss:$8 sps:$4 sm:$0xff]   ;;  %v1799_v4 = vld [vmem:[%s2833_s1 + $0x14] ss:$8 sps:$4 sm:$0xff]  }
   0x2   :  { %v1795_v1 = vld [vmem:[%s2833_s1 + $0x104] ss:$8 sps:$4 sm:$0xff]   ;;  %890 = vmatprep.subr.bf16.mxu1 %v1793_v0  ;;  %v1798_v3 = vld [vmem:[%s2833_s1 + $0x100] ss:$8 sps:$4 sm:$0xff]   ;;  %v1801_v5 = vld [vmem:[%s2833_s1 + $0x114] ss:$8 sps:$4 sm:$0xff]  }
   0x3   :  { %1003 = vmatprep.subr.bf16.mxu0 %v1795_v1  ;;  %891 = vmatpush1.bf16.msra.mxu1 %v1797_v2  ;;  %v1803_v6 = vld [vmem:[%s2833_s1 + $0x10] ss:$8 sps:$4 sm:$0xff]   ;;  %v1805_v8 = vld [vmem:[%s2833_s1 + $0x24] ss:$8 sps:$4 sm:$0xff]   ;;  %v1809_v10 = vld [vmem:[%s2833_s1 + $0x20] ss:$8 sps:$4 sm:$0xff]  }
   0x4   :  { %1004 = vmatpush1.bf16.msra.mxu0 %v1798_v3  ;;  %892 = vmatprep.subr.bf16.mxu1 %v1799_v4  ;;  %v1804_v7 = vld [vmem:[%s2833_s1 + $0x110] ss:$8 sps:$4 sm:$0xff]   ;;  %v1807_v9 = vld [vmem:[%s2833_s1 + $0x124] ss:$8 sps:$4 sm:$0xff]   ;;  %v1810_v11 = vld [vmem:[%s2833_s1 + $0x120] ss:$8 sps:$4 sm:$0xff]  }
   0x5   :  { %1005 = vmatprep.subr.bf16.mxu0 %v1801_v5  ;;  %v1811_v12 = vld [vmem:[%s2833_s1 + $0x34] ss:$8 sps:$4 sm:$0xff]   ;;  %v1815_v14 = vld [vmem:[%s2833_s1 + $0x30] ss:$8 sps:$4 sm:$0xff]   ;;  %v1817_v16 = vld [vmem:[%s2833_s1 + $0x44] ss:$8 sps:$4 sm:$0xff]  }
   0x6   :  { %v1813_v13 = vld [vmem:[%s2833_s1 + $0x134] ss:$8 sps:$4 sm:$0xff]   ;;  %v1816_v15 = vld [vmem:[%s2833_s1 + $0x130] ss:$8 sps:$4 sm:$0xff]   ;;  %v1819_v17 = vld [vmem:[%s2833_s1 + $0x144] ss:$8 sps:$4 sm:$0xff]  }
   0x7   :  { %893 = vmatpush1.bf16.msra.mxu1 %v1803_v6  ;;  %v1821_v18 = vld [vmem:[%s2833_s1 + $0x40] ss:$8 sps:$4 sm:$0xff]   ;;  %v1823_v20 = vld [vmem:[%s2833_s1 + $0x54] ss:$8 sps:$4 sm:$0xff]   ;;  %v1827_v22 = vld [vmem:[%s2833_s1 + $0x50] ss:$8 sps:$4 sm:$0xff]  }
   0x8   :  { %1006 = vmatpush1.bf16.msra.mxu0 %v1804_v7  ;;  %894 = vmatprep.subr.bf16.mxu1 %v1805_v8  ;;  %v1822_v19 = vld [vmem:[%s2833_s1 + $0x140] ss:$8 sps:$4 sm:$0xff]   ;;  %v1825_v21 = vld [vmem:[%s2833_s1 + $0x154] ss:$8 sps:$4 sm:$0xff]   ;;  %v1828_v23 = vld [vmem:[%s2833_s1 + $0x150] ss:$8 sps:$4 sm:$0xff]  }
   0x9   :  { %1007 = vmatprep.subr.bf16.mxu0 %v1807_v9  ;;  %v1829_v24 = vld [vmem:[%s2833_s1 + $0x64] ss:$8 sps:$4 sm:$0xff]   ;;  %v1833_v26 = vld [vmem:[%s2833_s1 + $0x60] ss:$8 sps:$4 sm:$0xff]   ;;  %v1835_v28 = vld [vmem:[%s2833_s1 + $0x74] ss:$8 sps:$4 sm:$0xff]  }
   0xa   :  { %v1831_v25 = vld [vmem:[%s2833_s1 + $0x164] ss:$8 sps:$4 sm:$0xff]   ;;  %v1834_v27 = vld [vmem:[%s2833_s1 + $0x160] ss:$8 sps:$4 sm:$0xff]   ;;  %v1837_v29 = vld [vmem:[%s2833_s1 + $0x174] ss:$8 sps:$4 sm:$0xff]  }
   0xb   :  { %895 = vmatpush1.bf16.msra.mxu1 %v1809_v10  ;;  %v1839_v30 = vld [vmem:[%s2833_s1 + $0x70] ss:$8 sps:$4 sm:$0xff]   ;;  %v1841_v32 = vld [vmem:[%s2833_s1 + $0x84] ss:$8 sps:$4 sm:$0xff]   ;;  %v1845_v34 = vld [vmem:[%s2833_s1 + $0x80] ss:$8 sps:$4 sm:$0xff]  }
   0xc   :  { %1008 = vmatpush1.bf16.msra.mxu0 %v1810_v11  ;;  %896 = vmatprep.subr.bf16.mxu1 %v1811_v12  ;;  %v1840_v31 = vld [vmem:[%s2833_s1 + $0x170] ss:$8 sps:$4 sm:$0xff]   ;;  %v1843_v33 = vld [vmem:[%s2833_s1 + $0x184] ss:$8 sps:$4 sm:$0xff]   ;;  %v1846_v35 = vld [vmem:[%s2833_s1 + $0x180] ss:$8 sps:$4 sm:$0xff]  }
   0xd   :  { %1009 = vmatprep.subr.bf16.mxu0 %v1813_v13  ;;  %v1847_v36 = vld [vmem:[%s2833_s1 + $0x94] ss:$8 sps:$4 sm:$0xff]   ;;  %v1851_v38 = vld [vmem:[%s2833_s1 + $0x90] ss:$8 sps:$4 sm:$0xff]   ;;  %v1853_v40 = vld [vmem:[%s2833_s1 + $0xa4] ss:$8 sps:$4 sm:$0xff]  }
   0xe   :  { %v1849_v37 = vld [vmem:[%s2833_s1 + $0x194] ss:$8 sps:$4 sm:$0xff]   ;;  %v1852_v39 = vld [vmem:[%s2833_s1 + $0x190] ss:$8 sps:$4 sm:$0xff]   ;;  %v1855_v41 = vld [vmem:[%s2833_s1 + $0x1a4] ss:$8 sps:$4 sm:$0xff]  }
   0xf   :  { %897 = vmatpush1.bf16.msra.mxu1 %v1815_v14  ;;  %v1857_v42 = vld [vmem:[%s2833_s1 + $0xa0] ss:$8 sps:$4 sm:$0xff]   ;;  %v1859_v44 = vld [vmem:[%s2833_s1 + $0xb4] ss:$8 sps:$4 sm:$0xff]   ;;  %v1863_v46 = vld [vmem:[%s2833_s1 + $0xb0] ss:$8 sps:$4 sm:$0xff]  }
  0x10   :  { %1010 = vmatpush1.bf16.msra.mxu0 %v1816_v15  ;;  %898 = vmatprep.subr.bf16.mxu1 %v1817_v16  ;;  %v1858_v43 = vld [vmem:[%s2833_s1 + $0x1a0] ss:$8 sps:$4 sm:$0xff]   ;;  %v1861_v45 = vld [vmem:[%s2833_s1 + $0x1b4] ss:$8 sps:$4 sm:$0xff]   ;;  %v1864_v47 = vld [vmem:[%s2833_s1 + $0x1b0] ss:$8 sps:$4 sm:$0xff]  }
  0x11   :  { %1011 = vmatprep.subr.bf16.mxu0 %v1819_v17  ;;  %v1865_v48 = vld [vmem:[%s2833_s1 + $0xc4] ss:$8 sps:$4 sm:$0xff]   ;;  %v1869_v52 = vld [vmem:[%s2833_s1 + $0xc0] ss:$8 sps:$4 sm:$0xff]   ;;  %v1871_v54 = vld [vmem:[%s2833_s1 + $0xd4] ss:$8 sps:$4 sm:$0xff]  }
  0x12   :  { %v1891_v49 = vld [vmem:[%s2834_s0 + $0x4] ss:$24 sps:$4 sm:$0xff]   ;;  %v1870_v53 = vld [vmem:[%s2833_s1 + $0x1c0] ss:$8 sps:$4 sm:$0xff]   ;;  %v1875_v56 = vld [vmem:[%s2833_s1 + $0xd0] ss:$8 sps:$4 sm:$0xff]  }
  0x13   :  { %899 = vmatpush1.bf16.msra.mxu1 %v1821_v18  ;;  %v1867_v50 = vld [vmem:[%s2833_s1 + $0x1c4] ss:$8 sps:$4 sm:$0xff]   ;;  %922 = vmatprep.mubr.bf16.mxu1 %v1891_v49  ;;  %v1873_v55 = vld [vmem:[%s2833_s1 + $0x1d4] ss:$8 sps:$4 sm:$0xff]   ;;  %v1876_v57 = vld [vmem:[%s2833_s1 + $0x1d0] ss:$8 sps:$4 sm:$0xff]  }
  0x14   :  { %1012 = vmatpush1.bf16.msra.mxu0 %v1822_v19  ;;  %900 = vmatprep.subr.bf16.mxu1 %v1823_v20  ;;  %v1894_v51 = vld [vmem:[%s2834_s0 + $0xc] ss:$24 sps:$4 sm:$0xff]   ;;  %v1881_v60 = vld [vmem:[%s2833_s1 + $0xe0] ss:$8 sps:$4 sm:$0xff]   ;;  %v1883_v62 = vld [vmem:[%s2833_s1 + $0xf4] ss:$8 sps:$4 sm:$0xff]  }
  0x15   :  { %1013 = vmatprep.subr.bf16.mxu0 %v1825_v21  ;;  %1035 = vmatprep.mubr.bf16.mxu0 %v1894_v51  ;;  %v1877_v58 = vld [vmem:[%s2833_s1 + $0xe4] ss:$8 sps:$4 sm:$0xff]   ;;  %v1882_v61 = vld [vmem:[%s2833_s1 + $0x1e0] ss:$8 sps:$4 sm:$0xff]   ;;  %v1885_v63 = vld [vmem:[%s2833_s1 + $0x1f4] ss:$8 sps:$4 sm:$0xff]  }
  0x16   :  { %v1879_v59 = vld [vmem:[%s2833_s1 + $0x1e4] ss:$8 sps:$4 sm:$0xff]   ;;  %v1887_v0 = vld [vmem:[%s2833_s1 + $0xf0] ss:$8 sps:$4 sm:$0xff]   ;;  %v1892_v4 = vld [vmem:[%s2834_s0 + $0x8] ss:$24 sps:$4 sm:$0xff]  }
  0x17   :  { %901 = vmatpush1.bf16.msra.mxu1 %v1827_v22  ;;  %v1888_v1 = vld [vmem:[%s2833_s1 + $0x1f0] ss:$8 sps:$4 sm:$0xff]   ;;  %v1897_v2 = vld [vmem:[%s2833_s1 + $0x204] ss:$8 sps:$4 sm:$0xff]   ;;  %v1895_v5 = vld [vmem:[%s2833_s1 + $0x200] ss:$8 sps:$4 sm:$0xff]  }
  0x18   :  { %1014 = vmatpush1.bf16.msra.mxu0 %v1828_v23  ;;  %902 = vmatprep.subr.bf16.mxu1 %v1829_v24  ;;  %v1889_v3 = vld [vmem:[%s2834_s0] ss:$24 sps:$4 sm:$0xff]   ;;  %v1900_v6 = vld [vmem:[%s2833_s1 + $0x214] ss:$8 sps:$4 sm:$0xff]   ;;  %v1909_v10 = vld [vmem:[%s2833_s1 + $0x224] ss:$8 sps:$4 sm:$0xff]  }
  0x19   :  { %1015 = vmatprep.subr.bf16.mxu0 %v1831_v25  ;;  %v1901_v7 = vld [vmem:[%s2834_s0 + $0x34] ss:$24 sps:$4 sm:$0xff]   ;;  %v1898_v9 = vld [vmem:[%s2833_s1 + $0x210] ss:$8 sps:$4 sm:$0xff]   ;;  %v1907_v13 = vld [vmem:[%s2833_s1 + $0x220] ss:$8 sps:$4 sm:$0xff]  }
  0x1a   :  { %v1903_v8 = vld [vmem:[%s2834_s0 + $0x3c] ss:$24 sps:$4 sm:$0xff]   ;;  %v1905_v11 = vld [vmem:[%s2834_s0 + $0x30] ss:$24 sps:$4 sm:$0xff]   ;;  %v1915_v16 = vld [vmem:[%s2834_s0 + $0x6c] ss:$24 sps:$4 sm:$0xff]  }
  0x1b   :  { %903 = vmatpush1.bf16.msra.mxu1 %v1833_v26  ;;  %v1906_v12 = vld [vmem:[%s2834_s0 + $0x38] ss:$24 sps:$4 sm:$0xff]   ;;  %v1912_v14 = vld [vmem:[%s2833_s1 + $0x234] ss:$8 sps:$4 sm:$0xff]   ;;  %v1921_v18 = vld [vmem:[%s2833_s1 + $0x244] ss:$8 sps:$4 sm:$0xff]  }
  0x1c   :  { %1016 = vmatpush1.bf16.msra.mxu0 %v1834_v27  ;;  %904 = vmatprep.subr.bf16.mxu1 %v1835_v28  ;;  %v1913_v15 = vld [vmem:[%s2834_s0 + $0x64] ss:$24 sps:$4 sm:$0xff]   ;;  %v1910_v17 = vld [vmem:[%s2833_s1 + $0x230] ss:$8 sps:$4 sm:$0xff]   ;;  %v1918_v20 = vld [vmem:[%s2834_s0 + $0x68] ss:$24 sps:$4 sm:$0xff]  }
  0x1d   :  { %1017 = vmatprep.subr.bf16.mxu0 %v1837_v29  ;;  %v1917_v19 = vld [vmem:[%s2834_s0 + $0x60] ss:$24 sps:$4 sm:$0xff]   ;;  %v1924_v22 = vld [vmem:[%s2833_s1 + $0x254] ss:$8 sps:$4 sm:$0xff]   ;;  %v1933_v26 = vld [vmem:[%s2833_s1 + $0x264] ss:$8 sps:$4 sm:$0xff]  }
  0x1e   :  { %v1919_v21 = vld [vmem:[%s2833_s1 + $0x240] ss:$8 sps:$4 sm:$0xff]   ;;  %v1925_v23 = vld [vmem:[%s2834_s0 + $0x94] ss:$24 sps:$4 sm:$0xff]   ;;  %v1922_v25 = vld [vmem:[%s2833_s1 + $0x250] ss:$8 sps:$4 sm:$0xff]  }
  0x1f   :  { %905 = vmatpush1.bf16.msra.mxu1 %v1839_v30  ;;  %v1927_v24 = vld [vmem:[%s2834_s0 + $0x9c] ss:$24 sps:$4 sm:$0xff]   ;;  %v1929_v27 = vld [vmem:[%s2834_s0 + $0x90] ss:$24 sps:$4 sm:$0xff]   ;;  %v1965_v51 = vld [vmem:[%s2834_s0 + $0x120] ss:$24 sps:$4 sm:$0xff]  }
  0x20   :  { %1018 = vmatpush1.bf16.msra.mxu0 %v1840_v31  ;;  %906 = vmatprep.subr.bf16.mxu1 %v1841_v32  ;;  %v1930_v28 = vld [vmem:[%s2834_s0 + $0x98] ss:$24 sps:$4 sm:$0xff]   ;;  %v1931_v29 = vld [vmem:[%s2833_s1 + $0x260] ss:$8 sps:$4 sm:$0xff]   ;;  %v1936_v30 = vld [vmem:[%s2833_s1 + $0x274] ss:$8 sps:$4 sm:$0xff]  }
  0x21   :  { %1019 = vmatprep.subr.bf16.mxu0 %v1843_v33  ;;  %v1937_v31 = vld [vmem:[%s2834_s0 + $0xc4] ss:$24 sps:$4 sm:$0xff]   ;;  %v1934_v33 = vld [vmem:[%s2833_s1 + $0x270] ss:$8 sps:$4 sm:$0xff]  }
  0x22   :  { %v1939_v32 = vld [vmem:[%s2834_s0 + $0xcc] ss:$24 sps:$4 sm:$0xff]   ;;  %v1958_v49 = vld [vmem:[%s2833_s1 + $0x2b0] ss:$8 sps:$4 sm:$0xff]  }
  0x23   :  { %907 = vmatpush1.bf16.msra.mxu1 %v1845_v34  ;;  %v1945_v34 = vld [vmem:[%s2833_s1 + $0x284] ss:$8 sps:$4 sm:$0xff]  }
  0x24   :  { %1020 = vmatpush1.bf16.msra.mxu0 %v1846_v35  ;;  %908 = vmatprep.subr.bf16.mxu1 %v1847_v36  ;;  %v1941_v35 = vld [vmem:[%s2834_s0 + $0xc0] ss:$24 sps:$4 sm:$0xff]  }
  0x25   :  { %1021 = vmatprep.subr.bf16.mxu0 %v1849_v37  ;;  %v1942_v36 = vld [vmem:[%s2834_s0 + $0xc8] ss:$24 sps:$4 sm:$0xff]  }
  0x26   :  { %v1943_v37 = vld [vmem:[%s2833_s1 + $0x280] ss:$8 sps:$4 sm:$0xff]  }
  0x27   :  { %909 = vmatpush1.bf16.msra.mxu1 %v1851_v38  ;;  %v1948_v38 = vld [vmem:[%s2833_s1 + $0x294] ss:$8 sps:$4 sm:$0xff]  }
  0x28   :  { %1022 = vmatpush1.bf16.msra.mxu0 %v1852_v39  ;;  %910 = vmatprep.subr.bf16.mxu1 %v1853_v40  ;;  %v1949_v39 = vld [vmem:[%s2834_s0 + $0xf4] ss:$24 sps:$4 sm:$0xff]  }
  0x29   :  { %1023 = vmatprep.subr.bf16.mxu0 %v1855_v41  ;;  %v1951_v40 = vld [vmem:[%s2834_s0 + $0xfc] ss:$24 sps:$4 sm:$0xff]   ;;  %v1946_v41 = vld [vmem:[%s2833_s1 + $0x290] ss:$8 sps:$4 sm:$0xff]  }
  0x2b   :  { %911 = vmatpush1.bf16.msra.mxu1 %v1857_v42  ;;  %v1957_v42 = vld [vmem:[%s2833_s1 + $0x2a4] ss:$8 sps:$4 sm:$0xff]  }
  0x2c   :  { %1024 = vmatpush1.bf16.msra.mxu0 %v1858_v43  ;;  %912 = vmatprep.subr.bf16.mxu1 %v1859_v44  ;;  %v1953_v43 = vld [vmem:[%s2834_s0 + $0xf0] ss:$24 sps:$4 sm:$0xff]  }
  0x2d   :  { %1025 = vmatprep.subr.bf16.mxu0 %v1861_v45  ;;  %v1954_v44 = vld [vmem:[%s2834_s0 + $0xf8] ss:$24 sps:$4 sm:$0xff]   ;;  %v1955_v45 = vld [vmem:[%s2833_s1 + $0x2a0] ss:$8 sps:$4 sm:$0xff]  }
  0x2f   :  { %913 = vmatpush1.bf16.msra.mxu1 %v1863_v46  ;;  %v1960_v46 = vld [vmem:[%s2833_s1 + $0x2b4] ss:$8 sps:$4 sm:$0xff]  }
  0x30   :  { %1026 = vmatpush1.bf16.msra.mxu0 %v1864_v47  ;;  %914 = vmatprep.subr.bf16.mxu1 %v1865_v48  ;;  %v1961_v47 = vld [vmem:[%s2834_s0 + $0x124] ss:$24 sps:$4 sm:$0xff]  }
  0x31   :  { %1027 = vmatprep.subr.bf16.mxu0 %v1867_v50  ;;  %v1963_v48 = vld [vmem:[%s2834_s0 + $0x12c] ss:$24 sps:$4 sm:$0xff]  }
  0x32   :  { %v1969_v50 = vld [vmem:[%s2833_s1 + $0x2c4] ss:$8 sps:$4 sm:$0xff]  }
  0x33   :  { %915 = vmatpush1.bf16.msra.mxu1 %v1869_v52  ;;  %v1966_v52 = vld [vmem:[%s2834_s0 + $0x128] ss:$24 sps:$4 sm:$0xff]  }
  0x34   :  { %1028 = vmatpush1.bf16.msra.mxu0 %v1870_v53  ;;  %916 = vmatprep.subr.bf16.mxu1 %v1871_v54  ;;  %v1967_v53 = vld [vmem:[%s2833_s1 + $0x2c0] ss:$8 sps:$4 sm:$0xff]   ;;  %v1972_v54 = vld [vmem:[%s2833_s1 + $0x2d4] ss:$8 sps:$4 sm:$0xff]  }
  0x35   :  { %1029 = vmatprep.subr.bf16.mxu0 %v1873_v55  ;;  %v1973_v55 = vld [vmem:[%s2834_s0 + $0x154] ss:$24 sps:$4 sm:$0xff]  }
  0x37   :  { %917 = vmatpush1.bf16.msra.mxu1 %v1875_v56  ;;  %v1975_v56 = vld [vmem:[%s2834_s0 + $0x15c] ss:$24 sps:$4 sm:$0xff]  }
  0x38   :  { %1030 = vmatpush1.bf16.msra.mxu0 %v1876_v57  ;;  %918 = vmatprep.subr.bf16.mxu1 %v1877_v58  ;;  %v1970_v57 = vld [vmem:[%s2833_s1 + $0x2d0] ss:$8 sps:$4 sm:$0xff]   ;;  %v1981_v58 = vld [vmem:[%s2833_s1 + $0x2e4] ss:$8 sps:$4 sm:$0xff]  }
  0x39   :  { %1031 = vmatprep.subr.bf16.mxu0 %v1879_v59  ;;  %v1977_v59 = vld [vmem:[%s2834_s0 + $0x150] ss:$24 sps:$4 sm:$0xff]  }
  0x3b   :  { %919 = vmatpush1.bf16.msra.mxu1 %v1881_v60  ;;  %v1978_v60 = vld [vmem:[%s2834_s0 + $0x158] ss:$24 sps:$4 sm:$0xff]  }
  0x3c   :  { %1032 = vmatpush1.bf16.msra.mxu0 %v1882_v61  ;;  %920 = vmatprep.subr.bf16.mxu1 %v1883_v62  ;;  %v1979_v61 = vld [vmem:[%s2833_s1 + $0x2e0] ss:$8 sps:$4 sm:$0xff]   ;;  %v1984_v62 = vld [vmem:[%s2833_s1 + $0x2f4] ss:$8 sps:$4 sm:$0xff]  }
  0x3d   :  { %1033 = vmatprep.subr.bf16.mxu0 %v1885_v63  ;;  %v1987_v63 = vld [vmem:[%s2834_s0 + $0x14] ss:$24 sps:$4 sm:$0xff]  }
  0x3f   :  { %921 = vmatpush1.bf16.msra.mxu1 %v1887_v0  ;;  %v1990_v0 = vld [vmem:[%s2834_s0 + $0xd4] ss:$24 sps:$4 sm:$0xff]  }
  0x40   :  { %1034 = vmatpush1.bf16.msra.mxu0 %v1888_v1  ;;  %1665 = vmatprep.subr.bf16.mxu1 %v1897_v2  ;;  %v1982_v1 = vld [vmem:[%s2833_s1 + $0x2f0] ss:$8 sps:$4 sm:$0xff]  }
  0x41   :  { %1116 = vmatprep.subr.bf16.mxu0 %v1897_v2  ;;  %v1985_v2 = vld [vmem:[%s2834_s0 + $0x10] ss:$24 sps:$4 sm:$0xff]  }
  0x42   :  { %923 = vmatmul.mubr.bf16.vlgmr.msra.gmra.mrb[0].mxu1 %v1889_v3  ;;  %v1988_v3 = vld [vmem:[%s2834_s0 + $0xd0] ss:$24 sps:$4 sm:$0xff]  }
  0x43   :  { %1036 = vmatmul.mubr.bf16.vlgmr.msra.gmra.mrb[0].mxu0 %v1892_v4  ;;  %1681 = vmatpush1.bf16.msra.mxu1 %v1895_v5  ;;  %v1991_v4 = vld [vmem:[%s2834_s0 + $0x44] ss:$24 sps:$4 sm:$0xff]  }
  0x44   :  { %1117 = vmatpush1.bf16.msra.mxu0 %v1895_v5  ;;  %1666 = vmatprep.subr.bf16.mxu1 %v1900_v6  ;;  %v1993_v5 = vld [vmem:[%s2834_s0 + $0x104] ss:$24 sps:$4 sm:$0xff]  }
  0x45   :  { %1118 = vmatprep.subr.bf16.mxu0 %v1900_v6  ;;  %932 = vmatprep.mubr.bf16.mxu1 %v1901_v7  ;;  %v1995_v6 = vld [vmem:[%s2834_s0 + $0x40] ss:$24 sps:$4 sm:$0xff]  }
  0x46   :  { %1045 = vmatprep.mubr.bf16.mxu0 %v1903_v8  ;;  %v1996_v7 = vld [vmem:[%s2834_s0 + $0x100] ss:$24 sps:$4 sm:$0xff]   ;;  %v1997_v8 = vld [vmem:[%s2834_s0 + $0x74] ss:$24 sps:$4 sm:$0xff]  }
  0x47   :  { %1682 = vmatpush1.bf16.msra.mxu1 %v1898_v9 }
  0x48   :  { %1119 = vmatpush1.bf16.msra.mxu0 %v1898_v9  ;;  %1667 = vmatprep.subr.bf16.mxu1 %v1909_v10  ;;  %v1999_v9 = vld [vmem:[%s2834_s0 + $0x134] ss:$24 sps:$4 sm:$0xff]  }
  0x49   :  { %1120 = vmatprep.subr.bf16.mxu0 %v1909_v10  ;;  %v2001_v10 = vld [vmem:[%s2834_s0 + $0x70] ss:$24 sps:$4 sm:$0xff]  }
  0x4a   :  { %933 = vmatmul.mubr.bf16.gmra.mrb[4].mxu1 %v1905_v11  ;;  %v2002_v11 = vld [vmem:[%s2834_s0 + $0x130] ss:$24 sps:$4 sm:$0xff]  }
  0x4b   :  { %1046 = vmatmul.mubr.bf16.gmra.mrb[4].mxu0 %v1906_v12  ;;  %1683 = vmatpush1.bf16.msra.mxu1 %v1907_v13  ;;  %v2003_v12 = vld [vmem:[%s2834_s0 + $0xa4] ss:$24 sps:$4 sm:$0xff]  }
  0x4c   :  { %1121 = vmatpush1.bf16.msra.mxu0 %v1907_v13  ;;  %1668 = vmatprep.subr.bf16.mxu1 %v1912_v14  ;;  %v2005_v13 = vld [vmem:[%s2834_s0 + $0x164] ss:$24 sps:$4 sm:$0xff]  }
  0x4d   :  { %1122 = vmatprep.subr.bf16.mxu0 %v1912_v14  ;;  %942 = vmatprep.mubr.bf16.mxu1 %v1913_v15  ;;  %v2007_v14 = vld [vmem:[%s2834_s0 + $0xa0] ss:$24 sps:$4 sm:$0xff]  }
  0x4e   :  { %1055 = vmatprep.mubr.bf16.mxu0 %v1915_v16  ;;  %v2008_v15 = vld [vmem:[%s2834_s0 + $0x160] ss:$24 sps:$4 sm:$0xff]  }
  0x4f   :  { %1684 = vmatpush1.bf16.msra.mxu1 %v1910_v17 }
  0x50   :  { %1123 = vmatpush1.bf16.msra.mxu0 %v1910_v17  ;;  %1669 = vmatprep.subr.bf16.mxu1 %v1921_v18 }
  0x51   :  { %1124 = vmatprep.subr.bf16.mxu0 %v1921_v18 }
  0x52   :  { %943 = vmatmul.mubr.bf16.gmra.mrb[8].mxu1 %v1917_v19 }
  0x53   :  { %1056 = vmatmul.mubr.bf16.gmra.mrb[8].mxu0 %v1918_v20  ;;  %1685 = vmatpush1.bf16.msra.mxu1 %v1919_v21 }
  0x54   :  { %1125 = vmatpush1.bf16.msra.mxu0 %v1919_v21  ;;  %1670 = vmatprep.subr.bf16.mxu1 %v1924_v22 }
  0x55   :  { %1126 = vmatprep.subr.bf16.mxu0 %v1924_v22  ;;  %952 = vmatprep.mubr.bf16.mxu1 %v1925_v23 }
  0x56   :  { %1065 = vmatprep.mubr.bf16.mxu0 %v1927_v24 }
  0x57   :  { %1686 = vmatpush1.bf16.msra.mxu1 %v1922_v25 }
  0x58   :  { %1127 = vmatpush1.bf16.msra.mxu0 %v1922_v25  ;;  %1671 = vmatprep.subr.bf16.mxu1 %v1933_v26 }
  0x59   :  { %1128 = vmatprep.subr.bf16.mxu0 %v1933_v26 }
  0x5a   :  { %953 = vmatmul.mubr.bf16.gmra.mrb[12].mxu1 %v1929_v27  ;;  %v160_v27 = vlaneseq }
  0x5b   :  { %1066 = vmatmul.mubr.bf16.gmra.mrb[12].mxu0 %v1930_v28  ;;  %1687 = vmatpush1.bf16.msra.mxu1 %v1931_v29 }
  0x5c   :  { %1129 = vmatpush1.bf16.msra.mxu0 %v1931_v29  ;;  %1672 = vmatprep.subr.bf16.mxu1 %v1936_v30  ;;  %v161_v29 = vshrl.u32 %v160_v27, 7 }
  0x5d   :  { %1130 = vmatprep.subr.bf16.mxu0 %v1936_v30  ;;  %962 = vmatprep.mubr.bf16.mxu1 %v1937_v31 }
  0x5e   :  { %1075 = vmatprep.mubr.bf16.mxu0 %v1939_v32 }
  0x5f   :  { %1688 = vmatpush1.bf16.msra.mxu1 %v1934_v33 }
  0x60   :  { %1131 = vmatpush1.bf16.msra.mxu0 %v1934_v33  ;;  %1673 = vmatprep.subr.bf16.mxu1 %v1945_v34  ;;  %v162_v33 = vsub.s32 0, %v161_v29 }
  0x61   :  { %1132 = vmatprep.subr.bf16.mxu0 %v1945_v34 }
  0x62   :  { %963 = vmatmul.mubr.bf16.gmra.mrb[16].mxu1 %v1941_v35  ;;  %v158_v35 = vld [vmem:[%s2835_s2] sm:$0x3] }
  0x63   :  { %1076 = vmatmul.mubr.bf16.gmra.mrb[16].mxu0 %v1942_v36  ;;  %1689 = vmatpush1.bf16.msra.mxu1 %v1943_v37  ;;  %v166_v36 = vsub.s32 1, %v161_v29 }
  0x64   :  { %1133 = vmatpush1.bf16.msra.mxu0 %v1943_v37  ;;  %1674 = vmatprep.subr.bf16.mxu1 %v1948_v38  ;;  %v2528_v37 = vrot.slane %v158_v35, %v162_v33 }
  0x65   :  { %1134 = vmatprep.subr.bf16.mxu0 %v1948_v38  ;;  %972 = vmatprep.mubr.bf16.mxu1 %v1949_v39  ;;  %v2530_v38 = vrot.slane %v158_v35, %v166_v36 }
  0x66   :  { %1085 = vmatprep.mubr.bf16.mxu0 %v1951_v40 }
  0x67   :  { %1690 = vmatpush1.bf16.msra.mxu1 %v1946_v41 }
  0x68   :  { %1135 = vmatpush1.bf16.msra.mxu0 %v1946_v41  ;;  %1675 = vmatprep.subr.bf16.mxu1 %v1957_v42 }
  0x69   :  { %1136 = vmatprep.subr.bf16.mxu0 %v1957_v42 }
  0x6a   :  { %973 = vmatmul.mubr.bf16.gmra.mrb[20].mxu1 %v1953_v43 }
  0x6b   :  { %1086 = vmatmul.mubr.bf16.gmra.mrb[20].mxu0 %v1954_v44  ;;  %1691 = vmatpush1.bf16.msra.mxu1 %v1955_v45 }
  0x6c   :  { %1137 = vmatpush1.bf16.msra.mxu0 %v1955_v45  ;;  %1676 = vmatprep.subr.bf16.mxu1 %v1960_v46 }
  0x6d   :  { %1138 = vmatprep.subr.bf16.mxu0 %v1960_v46  ;;  %982 = vmatprep.mubr.bf16.mxu1 %v1961_v47 }
  0x6e   :  { %1095 = vmatprep.mubr.bf16.mxu0 %v1963_v48 }
  0x6f   :  { %1692 = vmatpush1.bf16.msra.mxu1 %v1958_v49 }
  0x70   :  { %1139 = vmatpush1.bf16.msra.mxu0 %v1958_v49  ;;  %1677 = vmatprep.subr.bf16.mxu1 %v1969_v50 }
  0x71   :  { %1140 = vmatprep.subr.bf16.mxu0 %v1969_v50 }
  0x72   :  { %983 = vmatmul.mubr.bf16.gmra.mrb[24].mxu1 %v1965_v51 }
  0x73   :  { %1096 = vmatmul.mubr.bf16.gmra.mrb[24].mxu0 %v1966_v52  ;;  %1693 = vmatpush1.bf16.msra.mxu1 %v1967_v53 }
  0x74   :  { %1141 = vmatpush1.bf16.msra.mxu0 %v1967_v53  ;;  %1678 = vmatprep.subr.bf16.mxu1 %v1972_v54 }
  0x75   :  { %1142 = vmatprep.subr.bf16.mxu0 %v1972_v54  ;;  %992 = vmatprep.mubr.bf16.mxu1 %v1973_v55 }
  0x76   :  { %1105 = vmatprep.mubr.bf16.mxu0 %v1975_v56 }
  0x77   :  { %1694 = vmatpush1.bf16.msra.mxu1 %v1970_v57 }
  0x78   :  { %1143 = vmatpush1.bf16.msra.mxu0 %v1970_v57  ;;  %1679 = vmatprep.subr.bf16.mxu1 %v1981_v58 }
  0x79   :  { %1144 = vmatprep.subr.bf16.mxu0 %v1981_v58 }
  0x7a   :  { %993 = vmatmul.mubr.bf16.gmra.mrb[28].mxu1 %v1977_v59 }
  0x7b   :  { %1106 = vmatmul.mubr.bf16.gmra.mrb[28].mxu0 %v1978_v60  ;;  %1695 = vmatpush1.bf16.msra.mxu1 %v1979_v61 }
  0x7c   :  { %1145 = vmatpush1.bf16.msra.mxu0 %v1979_v61  ;;  %1680 = vmatprep.subr.bf16.mxu1 %v1984_v62 }
  0x7d   :  { %1146 = vmatprep.subr.bf16.mxu0 %v1984_v62  ;;  %1148 = vmatprep.mubr.bf16.mxu0 %v1987_v63 }
  0x7e   :  { %1188 = vmatprep.mubr.bf16.mxu1 %v1990_v0 }
  0x7f   :  { %1696 = vmatpush1.bf16.msra.mxu1 %v1982_v1 }
  0x80   :  { %1147 = vmatpush1.bf16.msra.mxu0 %v1982_v1 }
  0x82   :  { %1189 = vmatmul.mubr.bf16.vlgmr.msra.gmra.mrb[32].mxu1 %v1988_v3 }
  0x83   :  { %1149 = vmatmul.mubr.bf16.vlgmr.msra.gmra.mrb[0].mxu0 %v1985_v2  ;;  %1198 = vmatprep.mubr.bf16.mxu1 %v1993_v5 }
  0x84   :  { %1158 = vmatprep.mubr.bf16.mxu0 %v1991_v4 }
  0x8a   :  { %1199 = vmatmul.mubr.bf16.gmra.mrb[36].mxu1 %v1996_v7 }
  0x8b   :  { %1159 = vmatmul.mubr.bf16.gmra.mrb[4].mxu0 %v1995_v6  ;;  %1208 = vmatprep.mubr.bf16.mxu1 %v1999_v9 }
  0x8c   :  { %1168 = vmatprep.mubr.bf16.mxu0 %v1997_v8 }
  0x92   :  { %1209 = vmatmul.mubr.bf16.gmra.mrb[40].mxu1 %v2002_v11 }
  0x93   :  { %1169 = vmatmul.mubr.bf16.gmra.mrb[8].mxu0 %v2001_v10  ;;  %1218 = vmatprep.mubr.bf16.mxu1 %v2005_v13 }
  0x94   :  { %1178 = vmatprep.mubr.bf16.mxu0 %v2003_v12 }
  0x9a   :  { %1219 = vmatmul.mubr.bf16.gmra.mrb[44].mxu1 %v2008_v15 }
  0x9b   :  { %1179 = vmatmul.mubr.bf16.gmra.mrb[12].mxu0 %v2007_v14 }
 0x115   :  { %v2493_v16 = vpop.f32.mrb[0].mxu1 }
 0x116   :  { %v2495_v17 = vpop.f32.mrb[1].mxu1 }
 0x117   :  { %v2497_v18 = vpop.f32.mrb[2].mxu1 }
 0x118   :  { %v2499_v19 = vpop.f32.mrb[3].mxu1 }
 0x11d   :  { %v2501_v20 = vpop.f32.mrb[4].mxu1 }
 0x11e   :  { %v2503_v21 = vpop.f32.mrb[5].mxu1 }
 0x11f   :  { %v2505_v22 = vpop.f32.mrb[6].mxu1 }
 0x120   :  { %v2507_v23 = vpop.f32.mrb[7].mxu1 }
 0x125   :  { %v2509_v24 = vpop.f32.mrb[8].mxu1 }
 0x126   :  { %v2511_v25 = vpop.f32.mrb[9].mxu1 }
 0x127   :  { %v2513_v26 = vpop.f32.mrb[10].mxu1 }
 0x128   :  { %v2515_v28 = vpop.f32.mrb[11].mxu1 }
 0x12d   :  { %v2517_v30 = vpop.f32.mrb[12].mxu1 }
 0x12e   :  { %v2519_v31 = vpop.f32.mrb[13].mxu1 }
 0x12f   :  { %v2521_v32 = vpop.f32.mrb[14].mxu1 }
 0x130   :  { %v2523_v34 = vpop.f32.mrb[15].mxu1 }
 0x135   :  { %v964_v39 = vpop.f32.mrb[16].mxu1 }
 0x136   :  { %v1077_v40 = vpop.f32.mrb[16].mxu0  ;;  %v965_v41 = vadd.f32 %v964_v39, %v2528_v37  ;;  %v966_v42 = vpop.f32.mrb[17].mxu1 }
 0x137   :  { %v1079_v43 = vpop.f32.mrb[17].mxu0  ;;  %v967_v44 = vadd.f32 %v966_v42, %v2530_v38  ;;  %v968_v45 = vpop.f32.mrb[18].mxu1 }
 0x138   :  { %v1081_v46 = vpop.f32.mrb[18].mxu0  ;;  %v1078_v47 = vadd.f32 %v1077_v40, %v965_v41  ;;  %v969_v48 = vadd.f32 %v968_v45, %v2528_v37  ;;  %v970_v49 = vpop.f32.mrb[19].mxu1 }
 0x139   :  { %v1083_v50 = vpop.f32.mrb[19].mxu0  ;;  %v2535_v51 = vadd.f32 %v1079_v43, %v967_v44  ;;  %v971_v52 = vadd.f32 %v970_v49, %v2530_v38 }
 0x13a   :  { %v2538_v53 = vadd.f32 %v1081_v46, %v969_v48 }
 0x13b   :  { %v2540_v54 = vadd.f32 %v1083_v50, %v971_v52 }
 0x13d   :  { %v974_v55 = vpop.f32.mrb[20].mxu1 }
 0x13e   :  { %v1087_v56 = vpop.f32.mrb[20].mxu0  ;;  %v975_v57 = vadd.f32 %v974_v55, %v2528_v37  ;;  %v976_v58 = vpop.f32.mrb[21].mxu1 }
 0x13f   :  { %v1089_v59 = vpop.f32.mrb[21].mxu0  ;;  %v977_v60 = vadd.f32 %v976_v58, %v2530_v38  ;;  %v978_v61 = vpop.f32.mrb[22].mxu1 }
 0x140   :  { %v1091_v62 = vpop.f32.mrb[22].mxu0  ;;  %v2544_v63 = vadd.f32 %v1087_v56, %v975_v57  ;;  %v979_v0 = vadd.f32 %v978_v61, %v2528_v37  ;;  %v980_v1 = vpop.f32.mrb[23].mxu1  ;;  %v925_v61 = vadd.f32 %v2493_v16, %v2528_v37 }
 0x141   :  { %v1093_v2 = vpop.f32.mrb[23].mxu0  ;;  %v2547_v3 = vadd.f32 %v1089_v59, %v977_v60  ;;  %v981_v4 = vadd.f32 %v980_v1, %v2530_v38 }
 0x142   :  { %v2550_v5 = vadd.f32 %v1091_v62, %v979_v0  ;;  %v927_v62 = vadd.f32 %v2495_v17, %v2530_v38 }
 0x143   :  { %v2552_v6 = vadd.f32 %v1093_v2, %v981_v4  ;;  %v929_v2 = vadd.f32 %v2497_v18, %v2528_v37 }
 0x145   :  { %v984_v7 = vpop.f32.mrb[24].mxu1 }
 0x146   :  { %v1097_v8 = vpop.f32.mrb[24].mxu0  ;;  %v985_v9 = vadd.f32 %v984_v7, %v2528_v37  ;;  %v986_v10 = vpop.f32.mrb[25].mxu1 }
 0x147   :  { %v1099_v11 = vpop.f32.mrb[25].mxu0  ;;  %v987_v12 = vadd.f32 %v986_v10, %v2530_v38  ;;  %v988_v13 = vpop.f32.mrb[26].mxu1  ;;  %v931_v10 = vadd.f32 %v2499_v19, %v2530_v38 }
 0x148   :  { %v1101_v14 = vpop.f32.mrb[26].mxu0  ;;  %v2556_v15 = vadd.f32 %v1097_v8, %v985_v9  ;;  %v989_v27 = vadd.f32 %v988_v13, %v2528_v37  ;;  %v990_v29 = vpop.f32.mrb[27].mxu1 }
 0x149   :  { %v1103_v33 = vpop.f32.mrb[27].mxu0  ;;  %v2559_v35 = vadd.f32 %v1099_v11, %v987_v12  ;;  %v991_v36 = vadd.f32 %v990_v29, %v2530_v38 }
 0x14a   :  { %v2562_v39 = vadd.f32 %v1101_v14, %v989_v27 }
 0x14b   :  { %v2564_v40 = vadd.f32 %v1103_v33, %v991_v36 }
 0x14d   :  { %v994_v41 = vpop.f32.mrb[28].mxu1 }
 0x14e   :  { %v1107_v42 = vpop.f32.mrb[28].mxu0  ;;  %v995_v43 = vadd.f32 %v994_v41, %v2528_v37  ;;  %v996_v44 = vpop.f32.mrb[29].mxu1 }
 0x14f   :  { %v1109_v45 = vpop.f32.mrb[29].mxu0  ;;  %v997_v46 = vadd.f32 %v996_v44, %v2530_v38  ;;  %v998_v48 = vpop.f32.mrb[30].mxu1  ;;  %v939_v44 = vadd.f32 %v2505_v22, %v2528_v37 }
 0x150   :  { %v1111_v49 = vpop.f32.mrb[30].mxu0  ;;  %v2568_v50 = vadd.f32 %v1107_v42, %v995_v43  ;;  %v999_v52 = vadd.f32 %v998_v48, %v2528_v37  ;;  %v1000_v55 = vpop.f32.mrb[31].mxu1  ;;  %v937_v43 = vadd.f32 %v2503_v21, %v2530_v38 }
 0x151   :  { %v1113_v56 = vpop.f32.mrb[31].mxu0  ;;  %v2571_v57 = vadd.f32 %v1109_v45, %v997_v46  ;;  %v1001_v58 = vadd.f32 %v1000_v55, %v2530_v38 }
 0x152   :  { %v2574_v59 = vadd.f32 %v1111_v49, %v999_v52  ;;  %v941_v49 = vadd.f32 %v2507_v23, %v2530_v38 }
 0x153   :  { %v2576_v60 = vadd.f32 %v1113_v56, %v1001_v58 }
 0x155   :  { %v1190_v1 = vpop.f32.mrb[32].mxu1 }
 0x156   :  { %v1150_v0 = vpop.f32.mrb[0].mxu0  ;;  %v2586_v7 = vadd.f32 %v1190_v1, %v1078_v47  ;;  %v1192_v9 = vpop.f32.mrb[33].mxu1 }
 0x157   :  { %v2584_v4 = vadd.f32 %v1150_v0, %v925_v61  ;;  %v1152_v8 = vpop.f32.mrb[1].mxu0  ;;  %v2593_v16 = vadd.f32 %v1192_v9, %v2535_v51  ;;  %v1194_v12 = vpop.f32.mrb[34].mxu1 }
 0x158   :  { %v2590_v11 = vadd.f32 %v1152_v8, %v927_v62  ;;  %v1154_v17 = vpop.f32.mrb[2].mxu0  ;;  %v2598_v18 = vadd.f32 %v1194_v12, %v2538_v53  ;;  %v1196_v47 = vpop.f32.mrb[35].mxu1  ;;  %v1245_v53 = vmul.f32 %v2586_v7, %v2586_v7 }
 0x159   :  { %v2595_v13 = vadd.f32 %v1154_v17, %v929_v2  ;;  %v1156_v14 = vpop.f32.mrb[3].mxu0  ;;  %v1229_v27 = vmul.f32 %v2584_v4, %v2584_v4  ;;  %v2605_v19 = vadd.f32 %v1196_v47, %v2540_v54  ;;  %v1246_v36 = vmul.f32 %v2593_v16, %v2593_v16 }
 0x15a   :  { %v2602_v29 = vadd.f32 %v1156_v14, %v931_v10  ;;  %v1230_v51 = vmul.f32 %v2590_v11, %v2590_v11  ;;  %v1247_v33 = vmul.f32 %v2598_v18, %v2598_v18  ;;  %v935_v54 = vadd.f32 %v2501_v20, %v2528_v37 }
 0x15b   :  { %v1248_v42 = vmul.f32 %v2605_v19, %v2605_v19  ;;  %v1231_v52 = vmul.f32 %v2595_v13, %v2595_v13  ;;  %v1285_v0 = vadd.f32 %v1246_v36, %v1245_v53  ;;  %v949_v53 = vadd.f32 %v2513_v26, %v2528_v37 }
 0x15c   :  { %v1261_v41 = vadd.f32 %v1230_v51, %v1229_v27  ;;  %v1232_v22 = vmul.f32 %v2602_v29, %v2602_v29  ;;  %v945_v27 = vadd.f32 %v2509_v24, %v2528_v37 }
 0x15d   :  { %v1200_v46 = vpop.f32.mrb[36].mxu1  ;;  %v1288_v48 = vadd.f32 %v1248_v42, %v1247_v33  ;;  %v951_v42 = vadd.f32 %v2515_v28, %v2530_v38 }
 0x15e   :  { %v1160_v45 = vpop.f32.mrb[4].mxu0  ;;  %1262 = vadd.xlane.f32.xlu0 %v1261_v41  ;;  %v2630_v20 = vadd.f32 %v1200_v46, %v2544_v63  ;;  %v1202_v21 = vpop.f32.mrb[37].mxu1 }
 0x15f   :  { %v2627_v55 = vadd.f32 %v1160_v45, %v935_v54  ;;  %v1162_v56 = vpop.f32.mrb[5].mxu0  ;;  %v2637_v61 = vadd.f32 %v1202_v21, %v2547_v3  ;;  %v1204_v23 = vpop.f32.mrb[38].mxu1  ;;  %1289 = vadd.xlane.f32.xlu1 %v1288_v48 }
 0x160   :  { %v2634_v58 = vadd.f32 %v1162_v56, %v937_v43  ;;  %v1164_v62 = vpop.f32.mrb[6].mxu0  ;;  %v2644_v63 = vadd.f32 %v1204_v23, %v2550_v5  ;;  %v1206_v9 = vpop.f32.mrb[39].mxu1  ;;  %v1264_v5 = vadd.f32 %v1232_v22, %v1231_v52  ;;  %v1249_v51 = vmul.f32 %v2630_v20, %v2630_v20 }
 0x161   :  { %v1233_v1 = vmul.f32 %v2627_v55, %v2627_v55  ;;  %v2641_v2 = vadd.f32 %v1164_v62, %v939_v44  ;;  %v1166_v8 = vpop.f32.mrb[7].mxu0  ;;  %v2651_v3 = vadd.f32 %v1206_v9, %v2552_v6  ;;  %v1250_v33 = vmul.f32 %v2637_v61, %v2637_v61 }
 0x162   :  { %v1234_v10 = vmul.f32 %v2634_v58, %v2634_v58  ;;  %v2648_v17 = vadd.f32 %v1166_v8, %v941_v49  ;;  %1286 = vadd.xlane.f32.xlu0 %v1285_v0  ;;  %v947_v6 = vadd.f32 %v2511_v25, %v2530_v38  ;;  %v1251_v24 = vmul.f32 %v2644_v63, %v2644_v63 }
 0x163   :  { %v1235_v12 = vmul.f32 %v2641_v2, %v2641_v2  ;;  %v1252_v26 = vmul.f32 %v2651_v3, %v2651_v3  ;;  %v1291_v62 = vadd.f32 %v1250_v33, %v1249_v51  ;;  %v961_v51 = vadd.f32 %v2523_v34, %v2530_v38 }
 0x164   :  { %v1236_v14 = vmul.f32 %v2648_v17, %v2648_v17  ;;  %v1267_v47 = vadd.f32 %v1234_v10, %v1233_v1  ;;  %v955_v10 = vadd.f32 %v2517_v30, %v2528_v37 }
 0x165   :  { %v1210_v41 = vpop.f32.mrb[40].mxu1  ;;  %v1294_v8 = vadd.f32 %v1252_v26, %v1251_v24 }
 0x166   :  { %v1170_v36 = vpop.f32.mrb[8].mxu0  ;;  %1268 = vadd.xlane.f32.xlu1 %v1267_v47  ;;  %1265 = vadd.xlane.f32.xlu0 %v1264_v5  ;;  %v2674_v43 = vadd.f32 %v1210_v41, %v2556_v15  ;;  %v1212_v25 = vpop.f32.mrb[41].mxu1  ;;  %v1270_v49 = vadd.f32 %v1236_v14, %v1235_v12  ;;  %v957_v14 = vadd.f32 %v2519_v31, %v2530_v38 }
 0x167   :  { %v2671_v54 = vadd.f32 %v1170_v36, %v945_v27  ;;  %v1172_v44 = vpop.f32.mrb[9].mxu0  ;;  %v2681_v46 = vadd.f32 %v1212_v25, %v2559_v35  ;;  %v1214_v28 = vpop.f32.mrb[42].mxu1  ;;  %v959_v47 = vadd.f32 %v2521_v32, %v2528_v37 }
 0x168   :  { %v2678_v45 = vadd.f32 %v1172_v44, %v947_v6  ;;  %v1174_v48 = vpop.f32.mrb[10].mxu0  ;;  %v2688_v15 = vadd.f32 %v1214_v28, %v2562_v39  ;;  %v1216_v22 = vpop.f32.mrb[43].mxu1  ;;  %v1253_v12 = vmul.f32 %v2674_v43, %v2674_v43 }
 0x169   :  { %v1237_v52 = vmul.f32 %v2671_v54, %v2671_v54  ;;  %v2685_v56 = vadd.f32 %v1174_v48, %v949_v53  ;;  %v1176_v21 = vpop.f32.mrb[11].mxu0  ;;  %v2695_v35 = vadd.f32 %v1216_v22, %v2564_v40  ;;  %v1254_v40 = vmul.f32 %v2681_v46, %v2681_v46 }
 0x16a   :  { %v1238_v23 = vmul.f32 %v2678_v45, %v2678_v45  ;;  %v2692_v0 = vadd.f32 %v1176_v21, %v951_v42  ;;  %1271 = vadd.xlane.f32.xlu1 %v1270_v49  ;;  %1292 = vadd.xlane.f32.xlu0 %v1291_v62  ;;  %v1255_v30 = vmul.f32 %v2688_v15, %v2688_v15 }
 0x16b   :  { %v1239_v1 = vmul.f32 %v2685_v56, %v2685_v56  ;;  %v1256_v32 = vmul.f32 %v2695_v35, %v2695_v35  ;;  %v1297_v26 = vadd.f32 %v1254_v40, %v1253_v12 }
 0x16c   :  { %v1240_v39 = vmul.f32 %v2692_v0, %v2692_v0  ;;  %v1273_v9 = vadd.f32 %v1238_v23, %v1237_v52 }
 0x16d   :  { %v1220_v27 = vpop.f32.mrb[44].mxu1  ;;  %v1300_v52 = vadd.f32 %v1256_v32, %v1255_v30 }
 0x16e   :  { %v1180_v5 = vpop.f32.mrb[12].mxu0  ;;  %1295 = vadd.xlane.f32.xlu1 %v1294_v8  ;;  %v2718_v6 = vadd.f32 %v1220_v27, %v2568_v50  ;;  %1274 = vadd.xlane.f32.xlu0 %v1273_v9  ;;  %v1222_v31 = vpop.f32.mrb[45].mxu1  ;;  %v1276_v41 = vadd.f32 %v1240_v39, %v1239_v1 }
 0x16f   :  { %v2715_v33 = vadd.f32 %v1180_v5, %v955_v10  ;;  %v1182_v53 = vpop.f32.mrb[13].mxu0  ;;  %v2725_v36 = vadd.f32 %v1222_v31, %v2571_v57  ;;  %v1224_v38 = vpop.f32.mrb[46].mxu1 }
 0x170   :  { %v2722_v37 = vadd.f32 %v1182_v53, %v957_v14  ;;  %v1184_v34 = vpop.f32.mrb[14].mxu0  ;;  %v2732_v50 = vadd.f32 %v1224_v38, %v2574_v59  ;;  %v1226_v25 = vpop.f32.mrb[47].mxu1  ;;  %v1257_v22 = vmul.f32 %v2718_v6, %v2718_v6 }
 0x171   :  { %v1241_v42 = vmul.f32 %v2715_v33, %v2715_v33  ;;  %v2729_v24 = vadd.f32 %v1184_v34, %v959_v47  ;;  %v1186_v44 = vpop.f32.mrb[15].mxu0  ;;  %v2739_v57 = vadd.f32 %v1226_v25, %v2576_v60  ;;  %v1258_v62 = vmul.f32 %v2725_v36, %v2725_v36 }
 0x172   :  { %v1242_v48 = vmul.f32 %v2722_v37, %v2722_v37  ;;  %v2736_v28 = vadd.f32 %v1186_v44, %v961_v51  ;;  %1277 = vadd.xlane.f32.xlu1 %v1276_v41  ;;  %1298 = vadd.xlane.f32.xlu0 %v1297_v26  ;;  %v1259_v60 = vmul.f32 %v2732_v50, %v2732_v50 }
 0x173   :  { %v1243_v49 = vmul.f32 %v2729_v24, %v2729_v24  ;;  %v1260_v23 = vmul.f32 %v2739_v57, %v2739_v57  ;;  %v1303_v39 = vadd.f32 %v1258_v62, %v1257_v22 }
 0x174   :  { %v1244_v59 = vmul.f32 %v2736_v28, %v2736_v28  ;;  %v1279_v21 = vadd.f32 %v1242_v48, %v1241_v42 }
 0x175   :  { %v1306_v8 = vadd.f32 %v1260_v23, %v1259_v60 }
 0x176   :  { %1301 = vadd.xlane.f32.xlu1 %v1300_v52  ;;  %1280 = vadd.xlane.f32.xlu0 %v1279_v21  ;;  %v1282_v1 = vadd.f32 %v1244_v59, %v1243_v49 }
 0x17a   :  { %1283 = vadd.xlane.f32.xlu1 %v1282_v1  ;;  %1304 = vadd.xlane.f32.xlu0 %v1303_v39 }
 0x17e   :  { %1307 = vadd.xlane.f32.xlu1 %v1306_v8 }
 0x1eb   :  { %v1263_v9 = vpop.xlane.xlu0 %1262 }
 0x1ec   :  { %v1309_v10 = vmax.f32 %v1263_v9, 1e-24  ;;  %v1290_v12 = vpop.xlane.xlu1 %1289 }
 0x1ed   :  { %v1318_v40 = vmax.f32 %v1290_v12, 1e-24 }
 0x1ee   :  { %2009 = vrsqrt.f32 %v1309_v10 }
 0x1ef   :  { %v1287_v14 = vpop.xlane.xlu0 %1286  ;;  %2011 = vrsqrt.f32 %v1318_v40 }
 0x1f0   :  { %v1317_v47 = vmax.f32 %v1287_v14, 1e-24 }
 0x1f2   :  { %2013 = vrsqrt.f32 %v1317_v47 }
 0x1f3   :  { %v1269_v5 = vpop.xlane.xlu1 %1268  ;;  %v1266_v27 = vpop.xlane.xlu0 %1265 }
 0x1f4   :  { %v1311_v51 = vmax.f32 %v1269_v5, 1e-24  ;;  %v1310_v30 = vmax.f32 %v1266_v27, 1e-24 }
 0x1f6   :  { %2015 = vrsqrt.f32 %v1311_v51 }
 0x1f7   :  { %2017 = vrsqrt.f32 %v1310_v30  ;;  %v1272_v53 = vpop.xlane.xlu1 %1271  ;;  %v1293_v34 = vpop.xlane.xlu0 %1292 }
 0x1f8   :  { %v2010_v31 = vpop.eup %2009  ;;  %v1312_v32 = vmax.f32 %v1272_v53, 1e-24  ;;  %v1319_v42 = vmax.f32 %v1293_v34, 1e-24 }
 0x1f9   :  { %v1341_v38 = vmul.f32 %v2010_v31, %v2584_v4  ;;  %v1342_v41 = vmul.f32 %v2010_v31, %v2590_v11  ;;  %v2012_v44 = vpop.eup %2011 }
 0x1fa   :  { %2019 = vrsqrt.f32 %v1312_v32  ;;  %v1359_v26 = vmul.f32 %v2012_v44, %v2598_v18  ;;  %v1360_v48 = vmul.f32 %v2012_v44, %v2605_v19 }
 0x1fb   :  { %v1649_v25 = vpack.c.bf16 %v1342_v41, %v1341_v38  ;;  %2021 = vrsqrt.f32 %v1319_v42  ;;  %v1296_v49 = vpop.xlane.xlu1 %1295  ;;  %v1275_v21 = vpop.xlane.xlu0 %1274 }
 0x1fc   :  { %v2014_v59 = vpop.eup %2013  ;;  %v1320_v52 = vmax.f32 %v1296_v49, 1e-24  ;;  %v1658_v4 = vpack.c.bf16 %v1360_v48, %v1359_v26  ;;  %v1313_v62 = vmax.f32 %v1275_v21, 1e-24 }
 0x1fd   :  { %1469 = vst [vmem:[%s2836_s3] sm:$0xff] %v1649_v25  ;;  %v1357_v11 = vmul.f32 %v2014_v59, %v2586_v7  ;;  %v1358_v22 = vmul.f32 %v2014_v59, %v2593_v16 }
 0x1fe   :  { %2023 = vrsqrt.f32 %v1320_v52  ;;  %1478 = vst [vmem:[%s2836_s3 + $0x48] sm:$0xff] %v1658_v4 }
 0x1ff   :  { %v1657_v18 = vpack.c.bf16 %v1358_v22, %v1357_v11  ;;  %2025 = vrsqrt.f32 %v1313_v62  ;;  %v1278_v19 = vpop.xlane.xlu1 %1277  ;;  %v1299_v1 = vpop.xlane.xlu0 %1298 }
 0x200   :  { %v2016_v60 = vpop.eup %2015  ;;  %v1314_v23 = vmax.f32 %v1278_v19, 1e-24  ;;  %v1321_v8 = vmax.f32 %v1299_v1, 1e-24 }
 0x201   :  { %v2018_v39 = vpop.eup %2017  ;;  %1477 = vst [vmem:[%s2836_s3 + $0x40] sm:$0xff] %v1657_v18  ;;  %v1345_v7 = vmul.f32 %v2016_v60, %v2627_v55  ;;  %v1346_v16 = vmul.f32 %v2016_v60, %v2634_v58 }
 0x202   :  { %v1343_v9 = vmul.f32 %v2018_v39, %v2595_v13  ;;  %v1344_v10 = vmul.f32 %v2018_v39, %v2602_v29  ;;  %2027 = vrsqrt.f32 %v1314_v23 }
 0x203   :  { %v1651_v12 = vpack.c.bf16 %v1346_v16, %v1345_v7  ;;  %2029 = vrsqrt.f32 %v1321_v8  ;;  %v1302_v40 = vpop.xlane.xlu1 %1301  ;;  %v1281_v27 = vpop.xlane.xlu0 %1280 }
 0x204   :  { %v2020_v14 = vpop.eup %2019  ;;  %v1650_v47 = vpack.c.bf16 %v1344_v10, %v1343_v9  ;;  %v1322_v5 = vmax.f32 %v1302_v40, 1e-24  ;;  %v1315_v13 = vmax.f32 %v1281_v27, 1e-24 }
 0x205   :  { %v2022_v51 = vpop.eup %2021  ;;  %1471 = vst [vmem:[%s2836_s3 + $0x10] sm:$0xff] %v1651_v12  ;;  %v1347_v55 = vmul.f32 %v2020_v14, %v2641_v2  ;;  %v1348_v58 = vmul.f32 %v2020_v14, %v2648_v17 }
 0x206   :  { %1470 = vst [vmem:[%s2836_s3 + $0x8] sm:$0xff] %v1650_v47  ;;  %v1361_v29 = vmul.f32 %v2022_v51, %v2630_v20  ;;  %v1362_v30 = vmul.f32 %v2022_v51, %v2637_v61  ;;  %2031 = vrsqrt.f32 %v1322_v5 }
 0x207   :  { %v1652_v53 = vpack.c.bf16 %v1348_v58, %v1347_v55  ;;  %2033 = vrsqrt.f32 %v1315_v13  ;;  %v1284_v31 = vpop.xlane.xlu1 %1283  ;;  %v1305_v41 = vpop.xlane.xlu0 %1304 }
 0x208   :  { %v2024_v32 = vpop.eup %2023  ;;  %v1659_v34 = vpack.c.bf16 %v1362_v30, %v1361_v29  ;;  %v1316_v38 = vmax.f32 %v1284_v31, 1e-24  ;;  %v1323_v20 = vmax.f32 %v1305_v41, 1e-24 }
 0x209   :  { %v2026_v2 = vpop.eup %2025  ;;  %1472 = vst [vmem:[%s2836_s3 + $0x18] sm:$0xff] %v1652_v53  ;;  %v1363_v17 = vmul.f32 %v2024_v32, %v2644_v63  ;;  %v1364_v42 = vmul.f32 %v2024_v32, %v2651_v3 }
 0x20a   :  { %1479 = vst [vmem:[%s2836_s3 + $0x50] sm:$0xff] %v1659_v34  ;;  %v1349_v61 = vmul.f32 %v2026_v2, %v2671_v54  ;;  %v1350_v44 = vmul.f32 %v2026_v2, %v2678_v45  ;;  %2035 = vrsqrt.f32 %v1316_v38 }
 0x20b   :  { %v1660_v25 = vpack.c.bf16 %v1364_v42, %v1363_v17  ;;  %2037 = vrsqrt.f32 %v1323_v20  ;;  %v1308_v26 = vpop.xlane.xlu1 %1307 }
 0x20c   :  { %v2028_v48 = vpop.eup %2027  ;;  %v1653_v49 = vpack.c.bf16 %v1350_v44, %v1349_v61  ;;  %v1324_v59 = vmax.f32 %v1308_v26, 1e-24 }
 0x20d   :  { %v2030_v52 = vpop.eup %2029  ;;  %1480 = vst [vmem:[%s2836_s3 + $0x58] sm:$0xff] %v1660_v25  ;;  %v1351_v63 = vmul.f32 %v2028_v48, %v2685_v56  ;;  %v1352_v3 = vmul.f32 %v2028_v48, %v2692_v0 }
 0x20e   :  { %1473 = vst [vmem:[%s2836_s3 + $0x20] sm:$0xff] %v1653_v49  ;;  %v1365_v54 = vmul.f32 %v2030_v52, %v2674_v43  ;;  %v1366_v45 = vmul.f32 %v2030_v52, %v2681_v46  ;;  %2039 = vrsqrt.f32 %v1324_v59 }
 0x20f   :  { %v1654_v21 = vpack.c.bf16 %v1352_v3, %v1351_v63 }
 0x210   :  { %v2032_v4 = vpop.eup %2031  ;;  %v1661_v11 = vpack.c.bf16 %v1366_v45, %v1365_v54 }
 0x211   :  { %v2034_v22 = vpop.eup %2033  ;;  %1474 = vst [vmem:[%s2836_s3 + $0x28] sm:$0xff] %v1654_v21  ;;  %v1367_v56 = vmul.f32 %v2032_v4, %v2688_v15  ;;  %v1368_v0 = vmul.f32 %v2032_v4, %v2695_v35 }
 0x212   :  { %1481 = vst [vmem:[%s2836_s3 + $0x60] sm:$0xff] %v1661_v11  ;;  %v1353_v43 = vmul.f32 %v2034_v22, %v2715_v33  ;;  %v1354_v46 = vmul.f32 %v2034_v22, %v2722_v37 }
 0x213   :  { %v1662_v62 = vpack.c.bf16 %v1368_v0, %v1367_v56 }
 0x214   :  { %v2036_v18 = vpop.eup %2035  ;;  %v1655_v19 = vpack.c.bf16 %v1354_v46, %v1353_v43 }
 0x215   :  { %v2038_v60 = vpop.eup %2037  ;;  %1482 = vst [vmem:[%s2836_s3 + $0x68] sm:$0xff] %v1662_v62  ;;  %v1355_v15 = vmul.f32 %v2036_v18, %v2729_v24  ;;  %v1356_v35 = vmul.f32 %v2036_v18, %v2736_v28 }
 0x216   :  { %1475 = vst [vmem:[%s2836_s3 + $0x30] sm:$0xff] %v1655_v19  ;;  %v1369_v33 = vmul.f32 %v2038_v60, %v2718_v6  ;;  %v1370_v37 = vmul.f32 %v2038_v60, %v2725_v36 }
 0x217   :  { %v1656_v23 = vpack.c.bf16 %v1356_v35, %v1355_v15 }
 0x218   :  { %v2040_v1 = vpop.eup %2039  ;;  %v1663_v39 = vpack.c.bf16 %v1370_v37, %v1369_v33 }
 0x219   :  { %1476 = vst [vmem:[%s2836_s3 + $0x38] sm:$0xff] %v1656_v23  ;;  %v1371_v7 = vmul.f32 %v2040_v1, %v2732_v50  ;;  %v1372_v24 = vmul.f32 %v2040_v1, %v2739_v57 }
 0x21a   :  { %1483 = vst [vmem:[%s2836_s3 + $0x70] sm:$0xff] %v1663_v39 }
 0x21b   :  { %v1664_v28 = vpack.c.bf16 %v1372_v24, %v1371_v7 }
 0x21d   :  { %1484 = vst [vmem:[%s2836_s3 + $0x78] sm:$0xff] %v1664_v28 }

</bundles_post_ra>
